<compile_context>
chip_gen: v7x
topology: tpu7x:2x2x1
jax: 0.10.0
libtpu: 0.0.40
codegen_flags: <defaults>
</compile_context>

<pallas_src>
import jax
import jax.numpy as jnp
from jax import lax
from jax.experimental import pallas as pl
from jax.experimental.pallas import tpu as pltpu


def _vmem():
    return pl.BlockSpec(memory_space=pltpu.MemorySpace.VMEM)


# --------------------------------------------------------------------------- #
# Kernel 1: hoisted input projection for both directions:  x @ Wih_packed + b
# --------------------------------------------------------------------------- #
def _xproj_kernel(x_ref, w_ref, b_ref, out_ref):
    acc = jnp.dot(x_ref[...], w_ref[...], preferred_element_type=jnp.float32)
    out_ref[...] = (acc + b_ref[...]).astype(out_ref.dtype)


def _row_tile(n, target=512):
    """Largest multiple-of-8 row tile <= target that divides n; else one full block."""
    if n <= target:
        return n
    for t in range(target, 7, -8):
        if n % t == 0:
            return t
    # No multiple-of-8 divisor found: fall back to one full (un-pipelined) block.
    return n


def xproj(x_flat, wih_packed, b_packed):
    """[N, Din] @ [Din, 8H] + [1, 8H] -> [N, 8H] bf16 (bf16 operands, f32 accumulate)."""
    N, Din = x_flat.shape
    G = wih_packed.shape[1]
    tn = _row_tile(N)
    return pl.pallas_call(
        _xproj_kernel,
        out_shape=jax.ShapeDtypeStruct((N, G), jnp.bfloat16),
        grid=(N // tn,),
        in_specs=[
            pl.BlockSpec((tn, Din), lambda i: (i, 0)),
            pl.BlockSpec((Din, G), lambda i: (0, 0)),
            pl.BlockSpec((1, G), lambda i: (0, 0)),
        ],
        out_specs=pl.BlockSpec((tn, G), lambda i: (i, 0)),
        compiler_params=pltpu.CompilerParams(dimension_semantics=("parallel",)),
        cost_estimate=pl.CostEstimate(
            flops=2 * N * Din * G,
            transcendentals=0,
            bytes_accessed=2 * N * Din + 2 * Din * G + 4 * G + 2 * N * G,
        ),
    )(x_flat.astype(jnp.bfloat16), wih_packed.astype(jnp.bfloat16), b_packed)


# --------------------------------------------------------------------------- #
# Kernel 2: fused bidirectional LSTM recurrence (shared body + two epilogues)
# --------------------------------------------------------------------------- #
def _bilstm_recurrence(xp_ref, whh_ref, h_sc, c_sc, emit):
    """Fused forward+reverse LSTM recurrence.

    xp_ref : [T, B, 8H] bf16, pre-interleaved per step (fwd gate cols from t, rev gate
             cols from T-1-t).  Column layout gate-major (i,f,o,g), direction-minor
             ([fwd H | rev H] inside each 2H gate block).
    whh_ref: [2H, 8H] bf16 block-diagonal recurrent weights
             (rows 0:H act on h_fwd, rows H:2H on h_rev).
    h_sc/c_sc : [B, 2H] f32 running state ([fwd | rev]).
    emit(t, h): per-step sink for the new hidden state, in staged order (the rev half
             at step t belongs to sequence position T-1-t).
    """
    T = xp_ref.shape[0]
    H2 = h_sc.shape[-1]
    whh = whh_ref[...]                       # loop-invariant bf16 weights (hoisted)

    h_sc[...] = jnp.zeros_like(h_sc)
    c_sc[...] = jnp.zeros_like(c_sc)

    # TODO(synk): on v7x the two directions could run on the two TensorCores
    # (grid=(2,) over direction, "parallel"); kept fused for one v5e/v6e/v7x path.
    def step(t, carry):
        # Single xp load per step; bf16 MXU matmul with f32 accumulation.
        gates = xp_ref[t].astype(jnp.float32) + jnp.dot(
            h_sc[...].astype(jnp.bfloat16), whh,
            preferred_element_type=jnp.float32)                    # [B, 8H]
        sig = jax.nn.sigmoid(gates[:, :3 * H2])   # contiguous (i, f, o) blocks only
        i = sig[:, 0 * H2:1 * H2]
        f = sig[:, 1 * H2:2 * H2]
        o = sig[:, 2 * H2:3 * H2]
        g = jnp.tanh(gates[:, 3 * H2:])
        c = f * c_sc[...] + i * g
        h = o * jnp.tanh(c)
        c_sc[...] = c
        h_sc[...] = h
        emit(t, h)                             # off the loop-carried dependency chain
        return carry

    lax.fori_loop(0, T, step, 0)


def _bilstm_kernel(xp_ref, whh_ref, out_ref, h_sc, c_sc):
    # Intermediate layer: one full-width store per step, in staged order; the
    # consumer (wrapper) realigns the reverse half with a single vectorized flip.
    def emit(t, h):
        out_ref[t] = h.astype(out_ref.dtype)

    _bilstm_recurrence(xp_ref, whh_ref, h_sc, c_sc, emit)


def _bilstm_head_kernel(xp_ref, whh_ref, weff_ref, beff_ref, y_ref,
                        yf_sc, yr_sc, h_sc, c_sc):
    # Last layer: folded fc2(fc1(.)) head accumulated per step into tiny [T,B,1]
    # scratches (no [T,B,2H] residency); bias + sigmoid applied once post-loop.
    T = xp_ref.shape[0]
    H = h_sc.shape[-1] // 2
    w_row = weff_ref[...]                                  # [1, 2H] f32

    def emit(t, h):
        yprod = h * w_row                                  # [B, 2H]
        yf_sc[t] = jnp.sum(yprod[:, :H], axis=-1, keepdims=True)           # time t
        yr_sc[T - 1 - t] = jnp.sum(yprod[:, H:], axis=-1, keepdims=True)   # time T-1-t

    _bilstm_recurrence(xp_ref, whh_ref, h_sc, c_sc, emit)
    y_ref[...] = jax.nn.sigmoid(yf_sc[...] + yr_sc[...] + beff_ref[0, 0])


def bilstm_layer(xp_sel, whh_packed):
    """[T, B, 8H] pre-interleaved projections -> staged hidden sequence [T, B, 2H] bf16."""
    T, B, G = xp_sel.shape
    H2 = G // 4
    return pl.pallas_call(
        _bilstm_kernel,
        out_shape=jax.ShapeDtypeStruct((T, B, H2), jnp.bfloat16),
        in_specs=[_vmem(), _vmem()],
        out_specs=_vmem(),
        scratch_shapes=[pltpu.VMEM((B, H2), jnp.float32),
                        pltpu.VMEM((B, H2), jnp.float32)],
        cost_estimate=pl.CostEstimate(
            flops=2 * T * B * H2 * G,
            transcendentals=5 * T * B * H2,
            bytes_accessed=2 * T * B * G + 2 * H2 * G + 2 * T * B * H2,
        ),
    )(xp_sel, whh_packed)


def bilstm_layer_with_head(xp_sel, whh_packed, w_eff, b_eff):
    """Last layer: recurrence + folded fc1@fc2 head -> sigmoid logits [T, B, 1] f32."""
    T, B, G = xp_sel.shape
    H2 = G // 4
    return pl.pallas_call(
        _bilstm_head_kernel,
        out_shape=jax.ShapeDtypeStruct((T, B, 1), jnp.float32),
        in_specs=[_vmem(), _vmem(), _vmem(),
                  pl.BlockSpec(memory_space=pltpu.MemorySpace.SMEM)],
        out_specs=_vmem(),
        scratch_shapes=[pltpu.VMEM((T, B, 1), jnp.float32),
                        pltpu.VMEM((T, B, 1), jnp.float32),
                        pltpu.VMEM((B, H2), jnp.float32),
                        pltpu.VMEM((B, H2), jnp.float32)],
        cost_estimate=pl.CostEstimate(
            flops=2 * T * B * H2 * G + 4 * T * B * H2,
            transcendentals=5 * T * B * H2 + T * B,
            bytes_accessed=2 * T * B * G + 2 * H2 * G + 4 * H2 + 4 + 4 * T * B,
        ),
    )(xp_sel, whh_packed, w_eff, b_eff)


# --------------------------------------------------------------------------- #
# Forward pass
# --------------------------------------------------------------------------- #
def _interleave_directions(xp_flat, T, B, H):
    """[T*B, 8H] -> [T, B, 8H] with fwd gate columns from step t and rev gate columns
    from step T-1-t, so the serial recurrence loads a single xp[t] per step.  Pure-XLA
    pre-pass, fully pipelineable and off the recurrence's critical chain."""
    xp5 = xp_flat.reshape(T, B, 4, 2, H)
    fwd = xp5[:, :, :, 0, :]
    rev = jnp.flip(xp5[:, :, :, 1, :], axis=0)
    return jnp.stack([fwd, rev], axis=3).reshape(T, B, 8 * H)


def deg_lstm_forward(x, params):
    """x: [B, T, input_size] (batch_first, like PyTorch) -> [B, T-2, 1]."""
    lstm_layers, (w_eff, b_eff) = params
    B, T, _ = x.shape
    h = jnp.transpose(x, (1, 0, 2))                         # time-major [T, B, Din]
    n_layers = len(lstm_layers)
    y_tb = None
    for li, (wih_p, whh_p, b_p) in enumerate(lstm_layers):
        din = h.shape[-1]
        H = whh_p.shape[0] // 2
        xp = xproj(h.reshape(T * B, din), wih_p, b_p)       # [T*B, 8H] bf16
        xp_sel = _interleave_directions(xp, T, B, H)        # [T, B, 8H] bf16
        if li + 1 < n_layers:
            hstage = bilstm_layer(xp_sel, whh_p)            # staged [T, B, 2H] bf16
            # Realign the reverse half to its sequence position (cheap XLA flip).
            h = jnp.concatenate(
                [hstage[:, :, :H], jnp.flip(hstage[:, :, H:], axis=0)], axis=-1)
        else:
            y_tb = bilstm_layer_with_head(xp_sel, whh_p, w_eff, b_eff)   # [T, B, 1]
    # Note: for very long T a lane-dense [B, T] head output (skipping the trimmed
    # endpoints) would avoid masked output stores; [T, B, 1] kept for robustness.
    return jnp.transpose(y_tb, (1, 0, 2))[:, 1:-1, :]       # [B, T-2, 1]


# --------------------------------------------------------------------------- #
# Parameters: PyTorch-shaped raw params + packing into kernel layouts
# --------------------------------------------------------------------------- #
_GATE_PERM = (0, 1, 3, 2)   # PyTorch gate order (i,f,g,o) -> kernel order (i,f,o,g)


def init_raw_params(key, input_size, hidden, fc1_out, out_size, num_layers=2):
    """Deterministic params in nn.LSTM / nn.Linear layouts (gate order i,f,g,o)."""
    def uni(k, shape, scale):
        return jax.random.uniform(k, shape, jnp.float32, -scale, scale)

    keys = iter(jax.random.split(key, 16 * num_layers + 8))
    klstm = 1.0 / jnp.sqrt(hidden)
    layers = []
    in_size = input_size
    for _ in range(num_layers):
        dirs = []
        for _d in range(2):                                # forward, reverse
            wih = uni(next(keys), (4 * hidden, in_size), klstm)
            whh = uni(next(keys), (4 * hidden, hidden), klstm)
            bih = uni(next(keys), (4 * hidden,), klstm)
            bhh = uni(next(keys), (4 * hidden,), klstm)
            dirs.append((wih, whh, bih, bhh))
        layers.append(tuple(dirs))
        in_size = 2 * hidden
    k1 = 1.0 / jnp.sqrt(2 * hidden)
    w1 = uni(next(keys), (fc1_out, 2 * hidden), k1)
    b1 = uni(next(keys), (fc1_out,), k1)
    k2 = 1.0 / jnp.sqrt(fc1_out)
    w2 = uni(next(keys), (out_size, fc1_out), k2)
    b2 = uni(next(keys), (out_size,), k2)
    return layers, (w1, b1, w2, b2)


def pack_params(raw_params):
    """Pack PyTorch-layout params into the fused-kernel layouts."""
    layers, (w1, b1, w2, b2) = raw_params
    perm = jnp.array(_GATE_PERM)
    packed_layers = []
    for (fwd, rev) in layers:
        wih_f, whh_f, bih_f, bhh_f = fwd
        wih_r, whh_r, bih_r, bhh_r = rev
        H = whh_f.shape[1]
        din = wih_f.shape[1]

        def gates_t(w):      # [4H, X] -> [X, 4, H], gate axis reordered to (i,f,o,g)
            return w.T.reshape(-1, 4, H)[:, perm, :]

        # W_ih packed [Din, 8H]: columns gate-major (i,f,o,g), direction-minor (fwd,rev).
        wih_p = (jnp.stack([gates_t(wih_f), gates_t(wih_r)], axis=2)
                 .reshape(din, 8 * H).astype(jnp.bfloat16))
        # b_ih + b_hh folded once into the x-projection bias (kept f32).
        b_p = jnp.stack([(bih_f + bhh_f).reshape(4, H)[perm, :],
                         (bih_r + bhh_r).reshape(4, H)[perm, :]],
                        axis=1).reshape(1, 8 * H)
        # Block-diagonal recurrent weights [2H, 8H] in bf16 (single-pass MXU matmul):
        # rows 0:H act on h_fwd, rows H:2H on h_rev.
        whh_p = jnp.zeros((2 * H, 4, 2, H), jnp.float32)
        whh_p = whh_p.at[:H, :, 0, :].set(gates_t(whh_f))
        whh_p = whh_p.at[H:, :, 1, :].set(gates_t(whh_r))
        whh_p = whh_p.reshape(2 * H, 8 * H).astype(jnp.bfloat16)
        packed_layers.append((wih_p, whh_p, b_p))
    # fc1 -> fc2 has no nonlinearity in between (per the PyTorch module), so it folds
    # into a single row (output_size == 1):
    #   y = sigmoid(h @ (W2 @ W1).T + (W2 @ b1 + b2))
    w_eff = w2 @ w1                                        # [1, 2H]
    b_eff = (w2 @ b1 + b2).reshape(1, 1)                   # [1, 1]
    return packed_layers, (w_eff, b_eff)


# --------------------------------------------------------------------------- #
# Pure-JAX f32 reference (PyTorch semantics) for the correctness check
# --------------------------------------------------------------------------- #
def _ref_lstm_dir(x_tm, wih, whh, bih, bhh):
    H = whh.shape[1]
    B = x_tm.shape[1]

    def step(carry, xt):
        h, c = carry
        gates = xt @ wih.T + h @ whh.T + bih + bhh
        i = jax.nn.sigmoid(gates[:, 0 * H:1 * H])
        f = jax.nn.sigmoid(gates[:, 1 * H:2 * H])
        g = jnp.tanh(gates[:, 2 * H:3 * H])
        o = jax.nn.sigmoid(gates[:, 3 * H:4 * H])
        c_new = f * c + i * g
        h_new = o * jnp.tanh(c_new)
        return (h_new, c_new), h_new

    init = (jnp.zeros((B, H), jnp.float32), jnp.zeros((B, H), jnp.float32))
    _, hs = lax.scan(step, init, x_tm)
    return hs


def deg_lstm_reference(x, raw_params):
    layers, (w1, b1, w2, b2) = raw_params
    out = x
    for (fwd, rev) in layers:
        x_tm = jnp.transpose(out, (1, 0, 2))
        hf = _ref_lstm_dir(x_tm, *fwd)
        hr = jnp.flip(_ref_lstm_dir(jnp.flip(x_tm, axis=0), *rev), axis=0)
        out = jnp.transpose(jnp.concatenate([hf, hr], axis=-1), (1, 0, 2))
    y = jax.nn.sigmoid((out @ w1.T + b1) @ w2.T + b2)
    return y[:, 1:-1, :]


# --------------------------------------------------------------------------- #
if __name__ == "__main__":
    B, T = 2, 8
    INPUT_SIZE, HIDDEN, FC1, OUT = 768, 32, 8, 1     # module defaults

    key = jax.random.PRNGKey(0)
    k_params, k_x = jax.random.split(key)
    raw = init_raw_params(k_params, INPUT_SIZE, HIDDEN, FC1, OUT)
    params = pack_params(raw)
    x = jax.random.normal(k_x, (B, T, INPUT_SIZE), jnp.float32)

    fwd_fn = jax.jit(deg_lstm_forward)
    y = jax.block_until_ready(fwd_fn(x, params))
    assert y.shape == (B, T - 2, OUT), y.shape

    y_ref = jax.block_until_ready(deg_lstm_reference(x, raw))
    err = float(jnp.max(jnp.abs(y - y_ref)))
    # bf16 operands/storage on the projection + recurrence path (f32 accumulation);
    # the reference is pure f32, so the tolerance is looser than all-f32 math.
    assert err < 3e-2, f"max abs error {err}"
    print("KERNEL_OK")
</pallas_src>

<mosaic_0001>
module attributes {stable_mosaic.version = 11 : i64} {
  func.func @_xproj_kernel(%arg0: i32, %arg1: memref<16x768xbf16, #tpu.memory_space<vmem>>, %arg2: memref<768x256xbf16, #tpu.memory_space<vmem>>, %arg3: memref<1x256xf32, #tpu.memory_space<vmem>>, %arg4: memref<16x256xbf16, #tpu.memory_space<vmem>>) attributes {dimension_semantics = [#tpu.dimension_semantics<parallel>], iteration_bounds = array<i64: 1>, scalar_prefetch = 0 : i64, scratch_operands = 0 : i64, tpu.core_type = #tpu.core_type<tc>, window_params = [{transform_indices = @transform_0, window_bounds = array<i64: 16, 768>}, {pipeline_mode = #tpu.pipeline_mode<synchronous>, transform_indices = @transform_1, window_bounds = array<i64: 768, 256>}, {pipeline_mode = #tpu.pipeline_mode<synchronous>, transform_indices = @transform_2, window_bounds = array<i64: 1, 256>}, {transform_indices = @transform_3, window_bounds = array<i64: 16, 256>}]} {
    %c0 = arith.constant 0 : index
    %c0_0 = arith.constant 0 : index
    %0 = vector.load %arg1[%c0, %c0_0] : memref<16x768xbf16, #tpu.memory_space<vmem>>, vector<16x768xbf16>
    %c0_1 = arith.constant 0 : index
    %c0_2 = arith.constant 0 : index
    %1 = vector.load %arg2[%c0_1, %c0_2] : memref<768x256xbf16, #tpu.memory_space<vmem>>, vector<768x256xbf16>
    %cst = arith.constant dense<0.000000e+00> : vector<16x256xf32>
    %2 = tpu.matmul %0, %1, %cst {dimension_numbers = #tpu.dot_dimension_numbers<[1], [0], [0], [1], [0, 0, 1, 1], [], []>} : vector<16x768xbf16>, vector<768x256xbf16>, vector<16x256xf32> -> vector<16x256xf32>
    %c0_3 = arith.constant 0 : index
    %c0_4 = arith.constant 0 : index
    %3 = vector.load %arg3[%c0_3, %c0_4] : memref<1x256xf32, #tpu.memory_space<vmem>>, vector<1x256xf32>
    %4 = vector.broadcast %3 : vector<1x256xf32> to vector<16x256xf32>
    %5 = arith.addf %2, %4 : vector<16x256xf32>
    %6 = arith.truncf %5 : vector<16x256xf32> to vector<16x256xbf16>
    %c0_5 = arith.constant 0 : index
    %c0_6 = arith.constant 0 : index
    %7 = vector.load %arg4[%c0_5, %c0_6] : memref<16x256xbf16, #tpu.memory_space<vmem>>, vector<16x256xbf16>
    tpu.vector_store %arg4[%c0_5, %c0_6], %6 {strides = array<i32>} : memref<16x256xbf16, #tpu.memory_space<vmem>>, vector<16x256xbf16>,
    return
  }
  func.func @transform_0(%arg0: i32) -> (i32, i32) {
    %c0_i32 = arith.constant 0 : i32
    %c0_i32_0 = arith.constant 0 : i32
    return %arg0, %c0_i32 : i32, i32
  }
  func.func @transform_1(%arg0: i32) -> (i32, i32) {
    %c0_i32 = arith.constant 0 : i32
    %c0_i32_0 = arith.constant 0 : i32
    %c0_i32_1 = arith.constant 0 : i32
    return %c0_i32, %c0_i32_0 : i32, i32
  }
  func.func @transform_2(%arg0: i32) -> (i32, i32) {
    %c0_i32 = arith.constant 0 : i32
    %c0_i32_0 = arith.constant 0 : i32
    %c0_i32_1 = arith.constant 0 : i32
    return %c0_i32, %c0_i32_0 : i32, i32
  }
  func.func @transform_3(%arg0: i32) -> (i32, i32) {
    %c0_i32 = arith.constant 0 : i32
    %c0_i32_0 = arith.constant 0 : i32
    return %arg0, %c0_i32 : i32, i32
  }
}

module attributes {stable_mosaic.version = 11 : i64} {
  func.func @_bilstm_kernel(%arg0: memref<8x2x256xbf16, #tpu.memory_space<vmem>>, %arg1: memref<64x256xbf16, #tpu.memory_space<vmem>>, %arg2: memref<8x2x64xbf16, #tpu.memory_space<vmem>>, %arg3: memref<2x64xf32, #tpu.memory_space<vmem>>, %arg4: memref<2x64xf32, #tpu.memory_space<vmem>>) attributes {dimension_semantics = [], scalar_prefetch = 0 : i64, scratch_operands = 2 : i64, tpu.core_type = #tpu.core_type<tc>} {
    %c0 = arith.constant 0 : index
    %c0_0 = arith.constant 0 : index
    %0 = vector.load %arg1[%c0, %c0_0] : memref<64x256xbf16, #tpu.memory_space<vmem>>, vector<64x256xbf16>
    %cst = arith.constant 0.000000e+00 : f32
    %1 = vector.broadcast %cst : f32 to vector<2x64xf32>
    %c0_1 = arith.constant 0 : index
    %c0_2 = arith.constant 0 : index
    %2 = vector.load %arg3[%c0_1, %c0_2] : memref<2x64xf32, #tpu.memory_space<vmem>>, vector<2x64xf32>
    tpu.vector_store %arg3[%c0_1, %c0_2], %1 {strides = array<i32>} : memref<2x64xf32, #tpu.memory_space<vmem>>, vector<2x64xf32>,
    %cst_3 = arith.constant 0.000000e+00 : f32
    %3 = vector.broadcast %cst_3 : f32 to vector<2x64xf32>
    %c0_4 = arith.constant 0 : index
    %c0_5 = arith.constant 0 : index
    %4 = vector.load %arg4[%c0_4, %c0_5] : memref<2x64xf32, #tpu.memory_space<vmem>>, vector<2x64xf32>
    tpu.vector_store %arg4[%c0_4, %c0_5], %3 {strides = array<i32>} : memref<2x64xf32, #tpu.memory_space<vmem>>, vector<2x64xf32>,
    %c0_i32 = arith.constant 0 : i32
    %c8_i32 = arith.constant 8 : i32
    %5 = arith.addi %c0_i32, %c8_i32 : i32
    %c1_i32 = arith.constant 1 : i32
    scf.for %arg5 = %c0_i32 to %5 step %c1_i32  : i32 {
      %6 = arith.index_cast %arg5 : i32 to index
      %c0_7 = arith.constant 0 : index
      %c0_8 = arith.constant 0 : index
      %7 = vector.load %arg0[%6, %c0_7, %c0_8] : memref<8x2x256xbf16, #tpu.memory_space<vmem>>, vector<1x2x256xbf16>
      %8 = vector.shape_cast %7 : vector<1x2x256xbf16> to vector<2x256xbf16>
      %9 = arith.extf %8 : vector<2x256xbf16> to vector<2x256xf32>
      %c0_9 = arith.constant 0 : index
      %c0_10 = arith.constant 0 : index
      %10 = vector.load %arg3[%c0_9, %c0_10] : memref<2x64xf32, #tpu.memory_space<vmem>>, vector<2x64xf32>
      %11 = arith.truncf %10 : vector<2x64xf32> to vector<2x64xbf16>
      %cst_11 = arith.constant dense<0.000000e+00> : vector<2x256xf32>
      %12 = tpu.matmul %11, %0, %cst_11 {dimension_numbers = #tpu.dot_dimension_numbers<[1], [0], [0], [1], [0, 0, 1, 1], [], []>} : vector<2x64xbf16>, vector<64x256xbf16>, vector<2x256xf32> -> vector<2x256xf32>
      %13 = arith.addf %9, %12 : vector<2x256xf32>
      %14 = vector.extract_strided_slice %13 {offsets = [0, 0], sizes = [2, 192], strides = [1, 1]} : vector<2x256xf32> to vector<2x192xf32>
      %15 = arith.negf %14 : vector<2x192xf32>
      %16 = math.exp %15 : vector<2x192xf32>
      %cst_12 = arith.constant 1.000000e+00 : f32
      %17 = vector.broadcast %cst_12 : f32 to vector<2x192xf32>
      %18 = arith.addf %17, %16 : vector<2x192xf32>
      %19 = arith.divf %17, %18 : vector<2x192xf32>
      %20 = vector.extract_strided_slice %19 {offsets = [0, 0], sizes = [2, 64], strides = [1, 1]} : vector<2x192xf32> to vector<2x64xf32>
      %21 = vector.extract_strided_slice %19 {offsets = [0, 64], sizes = [2, 64], strides = [1, 1]} : vector<2x192xf32> to vector<2x64xf32>
      %22 = vector.extract_strided_slice %19 {offsets = [0, 128], sizes = [2, 64], strides = [1, 1]} : vector<2x192xf32> to vector<2x64xf32>
      %23 = vector.extract_strided_slice %13 {offsets = [0, 192], sizes = [2, 64], strides = [1, 1]} : vector<2x256xf32> to vector<2x64xf32>
      %24 = math.tanh %23 : vector<2x64xf32>
      %c0_13 = arith.constant 0 : index
      %c0_14 = arith.constant 0 : index
      %25 = vector.load %arg4[%c0_13, %c0_14] : memref<2x64xf32, #tpu.memory_space<vmem>>, vector<2x64xf32>
      %26 = arith.mulf %21, %25 : vector<2x64xf32>
      %27 = arith.mulf %20, %24 : vector<2x64xf32>
      %28 = arith.addf %26, %27 : vector<2x64xf32>
      %29 = math.tanh %28 : vector<2x64xf32>
      %30 = arith.mulf %22, %29 : vector<2x64xf32>
      %c0_15 = arith.constant 0 : index
      %c0_16 = arith.constant 0 : index
      %31 = vector.load %arg4[%c0_15, %c0_16] : memref<2x64xf32, #tpu.memory_space<vmem>>, vector<2x64xf32>
      tpu.vector_store %arg4[%c0_15, %c0_16], %28 {strides = array<i32>} : memref<2x64xf32, #tpu.memory_space<vmem>>, vector<2x64xf32>,
      %c0_17 = arith.constant 0 : index
      %c0_18 = arith.constant 0 : index
      %32 = vector.load %arg3[%c0_17, %c0_18] : memref<2x64xf32, #tpu.memory_space<vmem>>, vector<2x64xf32>
      tpu.vector_store %arg3[%c0_17, %c0_18], %30 {strides = array<i32>} : memref<2x64xf32, #tpu.memory_space<vmem>>, vector<2x64xf32>,
      %33 = arith.truncf %30 : vector<2x64xf32> to vector<2x64xbf16>
      %34 = arith.index_cast %arg5 : i32 to index
      %c0_19 = arith.constant 0 : index
      %c0_20 = arith.constant 0 : index
      %35 = vector.load %arg2[%34, %c0_19, %c0_20] : memref<8x2x64xbf16, #tpu.memory_space<vmem>>, vector<1x2x64xbf16>
      %36 = vector.shape_cast %35 : vector<1x2x64xbf16> to vector<2x64xbf16>
      %37 = vector.shape_cast %33 : vector<2x64xbf16> to vector<1x2x64xbf16>
      tpu.vector_store %arg2[%34, %c0_19, %c0_20], %37 {strides = array<i32>} : memref<8x2x64xbf16, #tpu.memory_space<vmem>>, vector<1x2x64xbf16>,
    }
    %c8_i32_6 = arith.constant 8 : i32
    return
  }
}

module attributes {stable_mosaic.version = 11 : i64} {
  func.func @_xproj_kernel(%arg0: i32, %arg1: memref<16x64xbf16, #tpu.memory_space<vmem>>, %arg2: memref<64x256xbf16, #tpu.memory_space<vmem>>, %arg3: memref<1x256xf32, #tpu.memory_space<vmem>>, %arg4: memref<16x256xbf16, #tpu.memory_space<vmem>>) attributes {dimension_semantics = [#tpu.dimension_semantics<parallel>], iteration_bounds = array<i64: 1>, scalar_prefetch = 0 : i64, scratch_operands = 0 : i64, tpu.core_type = #tpu.core_type<tc>, window_params = [{transform_indices = @transform_0, window_bounds = array<i64: 16, 64>}, {pipeline_mode = #tpu.pipeline_mode<synchronous>, transform_indices = @transform_1, window_bounds = array<i64: 64, 256>}, {pipeline_mode = #tpu.pipeline_mode<synchronous>, transform_indices = @transform_2, window_bounds = array<i64: 1, 256>}, {transform_indices = @transform_3, window_bounds = array<i64: 16, 256>}]} {
    %c0 = arith.constant 0 : index
    %c0_0 = arith.constant 0 : index
    %0 = vector.load %arg1[%c0, %c0_0] : memref<16x64xbf16, #tpu.memory_space<vmem>>, vector<16x64xbf16>
    %c0_1 = arith.constant 0 : index
    %c0_2 = arith.constant 0 : index
    %1 = vector.load %arg2[%c0_1, %c0_2] : memref<64x256xbf16, #tpu.memory_space<vmem>>, vector<64x256xbf16>
    %cst = arith.constant dense<0.000000e+00> : vector<16x256xf32>
    %2 = tpu.matmul %0, %1, %cst {dimension_numbers = #tpu.dot_dimension_numbers<[1], [0], [0], [1], [0, 0, 1, 1], [], []>} : vector<16x64xbf16>, vector<64x256xbf16>, vector<16x256xf32> -> vector<16x256xf32>
    %c0_3 = arith.constant 0 : index
    %c0_4 = arith.constant 0 : index
    %3 = vector.load %arg3[%c0_3, %c0_4] : memref<1x256xf32, #tpu.memory_space<vmem>>, vector<1x256xf32>
    %4 = vector.broadcast %3 : vector<1x256xf32> to vector<16x256xf32>
    %5 = arith.addf %2, %4 : vector<16x256xf32>
    %6 = arith.truncf %5 : vector<16x256xf32> to vector<16x256xbf16>
    %c0_5 = arith.constant 0 : index
    %c0_6 = arith.constant 0 : index
    %7 = vector.load %arg4[%c0_5, %c0_6] : memref<16x256xbf16, #tpu.memory_space<vmem>>, vector<16x256xbf16>
    tpu.vector_store %arg4[%c0_5, %c0_6], %6 {strides = array<i32>} : memref<16x256xbf16, #tpu.memory_space<vmem>>, vector<16x256xbf16>,
    return
  }
  func.func @transform_0(%arg0: i32) -> (i32, i32) {
    %c0_i32 = arith.constant 0 : i32
    %c0_i32_0 = arith.constant 0 : i32
    return %arg0, %c0_i32 : i32, i32
  }
  func.func @transform_1(%arg0: i32) -> (i32, i32) {
    %c0_i32 = arith.constant 0 : i32
    %c0_i32_0 = arith.constant 0 : i32
    %c0_i32_1 = arith.constant 0 : i32
    return %c0_i32, %c0_i32_0 : i32, i32
  }
  func.func @transform_2(%arg0: i32) -> (i32, i32) {
    %c0_i32 = arith.constant 0 : i32
    %c0_i32_0 = arith.constant 0 : i32
    %c0_i32_1 = arith.constant 0 : i32
    return %c0_i32, %c0_i32_0 : i32, i32
  }
  func.func @transform_3(%arg0: i32) -> (i32, i32) {
    %c0_i32 = arith.constant 0 : i32
    %c0_i32_0 = arith.constant 0 : i32
    return %arg0, %c0_i32 : i32, i32
  }
}

module attributes {stable_mosaic.version = 11 : i64} {
  func.func @_bilstm_head_kernel(%arg0: memref<8x2x256xbf16, #tpu.memory_space<vmem>>, %arg1: memref<64x256xbf16, #tpu.memory_space<vmem>>, %arg2: memref<1x64xf32, #tpu.memory_space<vmem>>, %arg3: memref<1x1xf32, #tpu.memory_space<smem>>, %arg4: memref<8x2x1xf32, #tpu.memory_space<vmem>>, %arg5: memref<8x2x1xf32, #tpu.memory_space<vmem>>, %arg6: memref<8x2x1xf32, #tpu.memory_space<vmem>>, %arg7: memref<2x64xf32, #tpu.memory_space<vmem>>, %arg8: memref<2x64xf32, #tpu.memory_space<vmem>>) attributes {dimension_semantics = [], scalar_prefetch = 0 : i64, scratch_operands = 4 : i64, tpu.core_type = #tpu.core_type<tc>} {
    %c0 = arith.constant 0 : index
    %c0_0 = arith.constant 0 : index
    %0 = vector.load %arg2[%c0, %c0_0] : memref<1x64xf32, #tpu.memory_space<vmem>>, vector<1x64xf32>
    %c0_1 = arith.constant 0 : index
    %c0_2 = arith.constant 0 : index
    %1 = vector.load %arg1[%c0_1, %c0_2] : memref<64x256xbf16, #tpu.memory_space<vmem>>, vector<64x256xbf16>
    %cst = arith.constant 0.000000e+00 : f32
    %2 = vector.broadcast %cst : f32 to vector<2x64xf32>
    %c0_3 = arith.constant 0 : index
    %c0_4 = arith.constant 0 : index
    %3 = vector.load %arg7[%c0_3, %c0_4] : memref<2x64xf32, #tpu.memory_space<vmem>>, vector<2x64xf32>
    tpu.vector_store %arg7[%c0_3, %c0_4], %2 {strides = array<i32>} : memref<2x64xf32, #tpu.memory_space<vmem>>, vector<2x64xf32>,
    %cst_5 = arith.constant 0.000000e+00 : f32
    %4 = vector.broadcast %cst_5 : f32 to vector<2x64xf32>
    %c0_6 = arith.constant 0 : index
    %c0_7 = arith.constant 0 : index
    %5 = vector.load %arg8[%c0_6, %c0_7] : memref<2x64xf32, #tpu.memory_space<vmem>>, vector<2x64xf32>
    tpu.vector_store %arg8[%c0_6, %c0_7], %4 {strides = array<i32>} : memref<2x64xf32, #tpu.memory_space<vmem>>, vector<2x64xf32>,
    %c0_i32 = arith.constant 0 : i32
    %c8_i32 = arith.constant 8 : i32
    %6 = arith.addi %c0_i32, %c8_i32 : i32
    %c1_i32 = arith.constant 1 : i32
    scf.for %arg9 = %c0_i32 to %6 step %c1_i32  : i32 {
      %19 = arith.index_cast %arg9 : i32 to index
      %c0_21 = arith.constant 0 : index
      %c0_22 = arith.constant 0 : index
      %20 = vector.load %arg0[%19, %c0_21, %c0_22] : memref<8x2x256xbf16, #tpu.memory_space<vmem>>, vector<1x2x256xbf16>
      %21 = vector.shape_cast %20 : vector<1x2x256xbf16> to vector<2x256xbf16>
      %22 = arith.extf %21 : vector<2x256xbf16> to vector<2x256xf32>
      %c0_23 = arith.constant 0 : index
      %c0_24 = arith.constant 0 : index
      %23 = vector.load %arg7[%c0_23, %c0_24] : memref<2x64xf32, #tpu.memory_space<vmem>>, vector<2x64xf32>
      %24 = arith.truncf %23 : vector<2x64xf32> to vector<2x64xbf16>
      %cst_25 = arith.constant dense<0.000000e+00> : vector<2x256xf32>
      %25 = tpu.matmul %24, %1, %cst_25 {dimension_numbers = #tpu.dot_dimension_numbers<[1], [0], [0], [1], [0, 0, 1, 1], [], []>} : vector<2x64xbf16>, vector<64x256xbf16>, vector<2x256xf32> -> vector<2x256xf32>
      %26 = arith.addf %22, %25 : vector<2x256xf32>
      %27 = vector.extract_strided_slice %26 {offsets = [0, 0], sizes = [2, 192], strides = [1, 1]} : vector<2x256xf32> to vector<2x192xf32>
      %28 = arith.negf %27 : vector<2x192xf32>
      %29 = math.exp %28 : vector<2x192xf32>
      %cst_26 = arith.constant 1.000000e+00 : f32
      %30 = vector.broadcast %cst_26 : f32 to vector<2x192xf32>
      %31 = arith.addf %30, %29 : vector<2x192xf32>
      %32 = arith.divf %30, %31 : vector<2x192xf32>
      %33 = vector.extract_strided_slice %32 {offsets = [0, 0], sizes = [2, 64], strides = [1, 1]} : vector<2x192xf32> to vector<2x64xf32>
      %34 = vector.extract_strided_slice %32 {offsets = [0, 64], sizes = [2, 64], strides = [1, 1]} : vector<2x192xf32> to vector<2x64xf32>
      %35 = vector.extract_strided_slice %32 {offsets = [0, 128], sizes = [2, 64], strides = [1, 1]} : vector<2x192xf32> to vector<2x64xf32>
      %36 = vector.extract_strided_slice %26 {offsets = [0, 192], sizes = [2, 64], strides = [1, 1]} : vector<2x256xf32> to vector<2x64xf32>
      %37 = math.tanh %36 : vector<2x64xf32>
      %c0_27 = arith.constant 0 : index
      %c0_28 = arith.constant 0 : index
      %38 = vector.load %arg8[%c0_27, %c0_28] : memref<2x64xf32, #tpu.memory_space<vmem>>, vector<2x64xf32>
      %39 = arith.mulf %34, %38 : vector<2x64xf32>
      %40 = arith.mulf %33, %37 : vector<2x64xf32>
      %41 = arith.addf %39, %40 : vector<2x64xf32>
      %42 = math.tanh %41 : vector<2x64xf32>
      %43 = arith.mulf %35, %42 : vector<2x64xf32>
      %c0_29 = arith.constant 0 : index
      %c0_30 = arith.constant 0 : index
      %44 = vector.load %arg8[%c0_29, %c0_30] : memref<2x64xf32, #tpu.memory_space<vmem>>, vector<2x64xf32>
      tpu.vector_store %arg8[%c0_29, %c0_30], %41 {strides = array<i32>} : memref<2x64xf32, #tpu.memory_space<vmem>>, vector<2x64xf32>,
      %c0_31 = arith.constant 0 : index
      %c0_32 = arith.constant 0 : index
      %45 = vector.load %arg7[%c0_31, %c0_32] : memref<2x64xf32, #tpu.memory_space<vmem>>, vector<2x64xf32>
      tpu.vector_store %arg7[%c0_31, %c0_32], %43 {strides = array<i32>} : memref<2x64xf32, #tpu.memory_space<vmem>>, vector<2x64xf32>,
      %46 = vector.broadcast %0 : vector<1x64xf32> to vector<2x64xf32>
      %47 = arith.mulf %43, %46 : vector<2x64xf32>
      %48 = vector.extract_strided_slice %47 {offsets = [0, 0], sizes = [2, 32], strides = [1, 1]} : vector<2x64xf32> to vector<2x32xf32>
      %cst_33 = arith.constant dense<0.000000e+00> : vector<2xf32>
      %49 = vector.multi_reduction <add>, %48, %cst_33 [1] : vector<2x32xf32> to vector<2xf32>
      %50 = vector.shape_cast %49 : vector<2xf32> to vector<2x1xf32>
      %51 = arith.index_cast %arg9 : i32 to index
      %c0_34 = arith.constant 0 : index
      %c0_35 = arith.constant 0 : index
      %52 = vector.load %arg5[%51, %c0_34, %c0_35] : memref<8x2x1xf32, #tpu.memory_space<vmem>>, vector<1x2x1xf32>
      %53 = vector.shape_cast %52 : vector<1x2x1xf32> to vector<2x1xf32>
      %54 = vector.shape_cast %50 : vector<2x1xf32> to vector<1x2x1xf32>
      tpu.vector_store %arg5[%51, %c0_34, %c0_35], %54 {strides = array<i32>} : memref<8x2x1xf32, #tpu.memory_space<vmem>>, vector<1x2x1xf32>,
      %55 = vector.extract_strided_slice %47 {offsets = [0, 32], sizes = [2, 32], strides = [1, 1]} : vector<2x64xf32> to vector<2x32xf32>
      %cst_36 = arith.constant dense<0.000000e+00> : vector<2xf32>
      %56 = vector.multi_reduction <add>, %55, %cst_36 [1] : vector<2x32xf32> to vector<2xf32>
      %57 = vector.shape_cast %56 : vector<2xf32> to vector<2x1xf32>
      %c7_i32 = arith.constant 7 : i32
      %58 = arith.subi %c7_i32, %arg9 : i32
      %59 = arith.index_cast %58 : i32 to index
      %c0_37 = arith.constant 0 : index
      %c0_38 = arith.constant 0 : index
      %60 = vector.load %arg6[%59, %c0_37, %c0_38] : memref<8x2x1xf32, #tpu.memory_space<vmem>>, vector<1x2x1xf32>
      %61 = vector.shape_cast %60 : vector<1x2x1xf32> to vector<2x1xf32>
      %62 = vector.shape_cast %57 : vector<2x1xf32> to vector<1x2x1xf32>
      tpu.vector_store %arg6[%59, %c0_37, %c0_38], %62 {strides = array<i32>} : memref<8x2x1xf32, #tpu.memory_space<vmem>>, vector<1x2x1xf32>,
    }
    %c8_i32_8 = arith.constant 8 : i32
    %c0_9 = arith.constant 0 : index
    %c0_10 = arith.constant 0 : index
    %c0_11 = arith.constant 0 : index
    %7 = vector.load %arg5[%c0_9, %c0_10, %c0_11] : memref<8x2x1xf32, #tpu.memory_space<vmem>>, vector<8x2x1xf32>
    %c0_12 = arith.constant 0 : index
    %c0_13 = arith.constant 0 : index
    %c0_14 = arith.constant 0 : index
    %8 = vector.load %arg6[%c0_12, %c0_13, %c0_14] : memref<8x2x1xf32, #tpu.memory_space<vmem>>, vector<8x2x1xf32>
    %9 = arith.addf %7, %8 : vector<8x2x1xf32>
    %c0_15 = arith.constant 0 : index
    %c0_16 = arith.constant 0 : index
    %10 = memref.load %arg3[%c0_15, %c0_16] : memref<1x1xf32, #tpu.memory_space<smem>>
    %11 = vector.broadcast %10 : f32 to vector<8x2x1xf32>
    %12 = arith.addf %9, %11 : vector<8x2x1xf32>
    %13 = arith.negf %12 : vector<8x2x1xf32>
    %14 = math.exp %13 : vector<8x2x1xf32>
    %cst_17 = arith.constant 1.000000e+00 : f32
    %15 = vector.broadcast %cst_17 : f32 to vector<8x2x1xf32>
    %16 = arith.addf %15, %14 : vector<8x2x1xf32>
    %17 = arith.divf %15, %16 : vector<8x2x1xf32>
    %c0_18 = arith.constant 0 : index
    %c0_19 = arith.constant 0 : index
    %c0_20 = arith.constant 0 : index
    %18 = vector.load %arg4[%c0_18, %c0_19, %c0_20] : memref<8x2x1xf32, #tpu.memory_space<vmem>>, vector<8x2x1xf32>
    tpu.vector_store %arg4[%c0_18, %c0_19, %c0_20], %17 {strides = array<i32>} : memref<8x2x1xf32, #tpu.memory_space<vmem>>, vector<8x2x1xf32>,
    return
  }
}

</mosaic_0001>

<bundles_post_ra>
// kernel: deg_lstm_forward.4
= control target key start
LH: loop header
LB: loop body
LE: loop exit
PB: predicated region body
PF: predicated region fallthrough
CT: control target
= control target key end

     0   :  { %8 = vsyncpa [#allocation3], 0  ;;  %s1098_s12 = smov [#allocation2]   ;;  %s1160_s0 = inlined_call_operand.vmem [shape: bf16[16,768], index: 0, kind: input, shape index: {}]   ;;  %s1161_s1 = inlined_call_operand.hbm [shape: bf16[768,256], index: 1, kind: input, shape index: {}]   ;;  %s1162_s2 = inlined_call_operand.vmem [shape: f32[1,256], index: 2, kind: input, shape index: {}]   ;;  %s1163_s3 = inlined_call_operand.vmem [shape: bf16[16,256], index: 3, kind: output, shape index: {}]  }
   0x1   :  { %s16_s13 = sshll.u32 %s1098_s12, 4  ;;  %s1074_s16 = scalar_lea.hbm %s1161_s1, 12288  ;;  %s17_s13 = int_to_ptr.vmem [resolvable:$true] %s16_s13 }
   0x2   :  { %p1075_p0 = scmp.ne.s32.totalorder %s1161_s1, %s1074_s16  ;;  %p1078_p1 = scmp.lt.u32.totalorder %s1074_s16, %s1161_s1 }
   0x4   :  { %p1080_p2 = pnand %p1078_p1, %p1075_p0 }
   0x6   :  { %1083 = shalt.err (!%p1080_p2)
}
   0x7   :  { %s1084_s21 = scalar_lea.vmem %s17_s13, 12288  ;;  %p1089_p4 = scmp.lt.s32.totalorder %s17_s13, %s17_s13 }
   0x8   :  { %p1085_p3 = scmp.ne.s32.totalorder %s17_s13, %s1084_s21  ;;  %p1090_p5 = scmp.lt.s32.totalorder %s1084_s21, %s1084_s21 }
   0xa   :  { %p1091_p6 = por %p1090_p5, %p1089_p4 }
   0xc   :  { %p1092_p7 = pnand %p1091_p6, %p1085_p3 }
   0xe   :  { %1095 = shalt.err (!%p1092_p7)
}
   0xf   :  { %s1099_s22 = smov 128   ;;  %s1100_s23 = smov 8  }
  0x10   :  { %22 = dma.hbm_to_vmem [thread:$0]  %s1161_s1, 12288, %s17_s13, [#allocation3], %s1099_s22, %s1099_s22, %s1100_s23  }
  0x11   :  { %1096 = dma.done.wait [#allocation3], 12288  }
  0x12   :  { %1097 = vsyncadd [#allocation3], 4294955008  ;;  %v921_v0 = vld [vmem:[#allocation2 + $0x104] ss:$8 sps:$4 sm:$0xff]   ;;  %v923_v1 = vld [vmem:[#allocation2 + $0x100] ss:$8 sps:$4 sm:$0xff]  }
  0x13   :  { %695 = vmatprep.subr.bf16.mxu0 %v921_v0  ;;  %v924_v2 = vld [vmem:[#allocation2 + $0x114] ss:$8 sps:$4 sm:$0xff]   ;;  %v926_v3 = vld [vmem:[#allocation2 + $0x110] ss:$8 sps:$4 sm:$0xff]   ;;  %v927_v4 = vld [vmem:[#allocation2 + $0x124] ss:$8 sps:$4 sm:$0xff]  }
  0x14   :  { %696 = vmatpush1.bf16.msra.mxu0 %v923_v1  ;;  %v929_v5 = vld [vmem:[#allocation2 + $0x120] ss:$8 sps:$4 sm:$0xff]   ;;  %v930_v6 = vld [vmem:[#allocation2 + $0x134] ss:$8 sps:$4 sm:$0xff]   ;;  %v932_v7 = vld [vmem:[#allocation2 + $0x130] ss:$8 sps:$4 sm:$0xff]  }
  0x15   :  { %697 = vmatprep.subr.bf16.mxu0 %v924_v2  ;;  %v933_v8 = vld [vmem:[#allocation2 + $0x144] ss:$8 sps:$4 sm:$0xff]   ;;  %v935_v9 = vld [vmem:[#allocation2 + $0x140] ss:$8 sps:$4 sm:$0xff]   ;;  %v936_v10 = vld [vmem:[#allocation2 + $0x154] ss:$8 sps:$4 sm:$0xff]  }
  0x16   :  { %v938_v11 = vld [vmem:[#allocation2 + $0x150] ss:$8 sps:$4 sm:$0xff]   ;;  %v939_v12 = vld [vmem:[#allocation2 + $0x164] ss:$8 sps:$4 sm:$0xff]   ;;  %v968_v14 = vld [vmem:[#allocation2] ss:$8 sps:$4 sm:$0xff]  }
  0x17   :  { %v966_v13 = vld [vmem:[#allocation2 + $0x4] ss:$8 sps:$4 sm:$0xff]   ;;  %v941_v15 = vld [vmem:[#allocation2 + $0x160] ss:$8 sps:$4 sm:$0xff]   ;;  %v972_v16 = vld [vmem:[#allocation2 + $0x14] ss:$8 sps:$4 sm:$0xff]  }
  0x18   :  { %698 = vmatpush1.bf16.msra.mxu0 %v926_v3  ;;  %652 = vmatprep.subr.bf16.mxu1 %v966_v13  ;;  %v974_v17 = vld [vmem:[#allocation2 + $0x10] ss:$8 sps:$4 sm:$0xff]   ;;  %v942_v18 = vld [vmem:[#allocation2 + $0x174] ss:$8 sps:$4 sm:$0xff]   ;;  %v977_v19 = vld [vmem:[%s1160_s0 + $0xc] ss:$24 sps:$4 sm:$0xff]  }
  0x19   :  { %699 = vmatprep.subr.bf16.mxu0 %v927_v4  ;;  %653 = vmatpush1.bf16.msra.mxu1 %v968_v14  ;;  %v944_v20 = vld [vmem:[#allocation2 + $0x170] ss:$8 sps:$4 sm:$0xff]   ;;  %v981_v21 = vld [vmem:[#allocation2 + $0x24] ss:$8 sps:$4 sm:$0xff]   ;;  %v983_v22 = vld [vmem:[#allocation2 + $0x20] ss:$8 sps:$4 sm:$0xff]  }
  0x1a   :  { %654 = vmatprep.subr.bf16.mxu1 %v972_v16  ;;  %v945_v23 = vld [vmem:[#allocation2 + $0x184] ss:$8 sps:$4 sm:$0xff]   ;;  %727 = vmatprep.mubr.bf16.mxu0 %v977_v19  ;;  %v947_v24 = vld [vmem:[#allocation2 + $0x180] ss:$8 sps:$4 sm:$0xff]   ;;  %v987_v25 = vld [vmem:[#allocation2 + $0x34] ss:$8 sps:$4 sm:$0xff]  }
  0x1b   :  { %v948_v26 = vld [vmem:[#allocation2 + $0x194] ss:$8 sps:$4 sm:$0xff]   ;;  %v989_v27 = vld [vmem:[#allocation2 + $0x30] ss:$8 sps:$4 sm:$0xff]   ;;  %v993_v28 = vld [vmem:[#allocation2 + $0x44] ss:$8 sps:$4 sm:$0xff]  }
  0x1c   :  { %700 = vmatpush1.bf16.msra.mxu0 %v929_v5  ;;  %v950_v29 = vld [vmem:[#allocation2 + $0x190] ss:$8 sps:$4 sm:$0xff]   ;;  %v951_v30 = vld [vmem:[#allocation2 + $0x1a4] ss:$8 sps:$4 sm:$0xff]   ;;  %v995_v31 = vld [vmem:[#allocation2 + $0x40] ss:$8 sps:$4 sm:$0xff]  }
  0x1d   :  { %701 = vmatprep.subr.bf16.mxu0 %v930_v6  ;;  %655 = vmatpush1.bf16.msra.mxu1 %v974_v17  ;;  %v999_v32 = vld [vmem:[#allocation2 + $0x54] ss:$8 sps:$4 sm:$0xff]   ;;  %v953_v33 = vld [vmem:[#allocation2 + $0x1a0] ss:$8 sps:$4 sm:$0xff]   ;;  %v1001_v35 = vld [vmem:[#allocation2 + $0x50] ss:$8 sps:$4 sm:$0xff]  }
  0x1e   :  { %656 = vmatprep.subr.bf16.mxu1 %v981_v21  ;;  %v954_v34 = vld [vmem:[#allocation2 + $0x1b4] ss:$8 sps:$4 sm:$0xff]   ;;  %v1005_v36 = vld [vmem:[#allocation2 + $0x64] ss:$8 sps:$4 sm:$0xff]   ;;  %v956_v37 = vld [vmem:[#allocation2 + $0x1b0] ss:$8 sps:$4 sm:$0xff]  }
  0x1f   :  { %v957_v38 = vld [vmem:[#allocation2 + $0x1c4] ss:$8 sps:$4 sm:$0xff]   ;;  %v1007_v39 = vld [vmem:[#allocation2 + $0x60] ss:$8 sps:$4 sm:$0xff]   ;;  %v1011_v40 = vld [vmem:[#allocation2 + $0x74] ss:$8 sps:$4 sm:$0xff]  }
  0x20   :  { %702 = vmatpush1.bf16.msra.mxu0 %v932_v7  ;;  %v959_v41 = vld [vmem:[#allocation2 + $0x1c0] ss:$8 sps:$4 sm:$0xff]   ;;  %v960_v42 = vld [vmem:[#allocation2 + $0x1d4] ss:$8 sps:$4 sm:$0xff]   ;;  %v1013_v43 = vld [vmem:[#allocation2 + $0x70] ss:$8 sps:$4 sm:$0xff]  }
  0x21   :  { %703 = vmatprep.subr.bf16.mxu0 %v933_v8  ;;  %657 = vmatpush1.bf16.msra.mxu1 %v983_v22  ;;  %v1017_v44 = vld [vmem:[#allocation2 + $0x84] ss:$8 sps:$4 sm:$0xff]   ;;  %v962_v45 = vld [vmem:[#allocation2 + $0x1d0] ss:$8 sps:$4 sm:$0xff]   ;;  %v1019_v47 = vld [vmem:[#allocation2 + $0x80] ss:$8 sps:$4 sm:$0xff]  }
  0x22   :  { %658 = vmatprep.subr.bf16.mxu1 %v987_v25  ;;  %v963_v46 = vld [vmem:[#allocation2 + $0x1e4] ss:$8 sps:$4 sm:$0xff]   ;;  %v1023_v48 = vld [vmem:[#allocation2 + $0x94] ss:$8 sps:$4 sm:$0xff]   ;;  %v965_v49 = vld [vmem:[#allocation2 + $0x1e0] ss:$8 sps:$4 sm:$0xff]  }
  0x23   :  { %v969_v50 = vld [vmem:[#allocation2 + $0x1f4] ss:$8 sps:$4 sm:$0xff]   ;;  %v1025_v51 = vld [vmem:[#allocation2 + $0x90] ss:$8 sps:$4 sm:$0xff]   ;;  %v1029_v52 = vld [vmem:[#allocation2 + $0xa4] ss:$8 sps:$4 sm:$0xff]  }
  0x24   :  { %704 = vmatpush1.bf16.msra.mxu0 %v935_v9  ;;  %v971_v53 = vld [vmem:[#allocation2 + $0x1f0] ss:$8 sps:$4 sm:$0xff]   ;;  %v980_v54 = vld [vmem:[#allocation2 + $0x204] ss:$8 sps:$4 sm:$0xff]   ;;  %v1031_v55 = vld [vmem:[#allocation2 + $0xa0] ss:$8 sps:$4 sm:$0xff]  }
  0x25   :  { %705 = vmatprep.subr.bf16.mxu0 %v936_v10  ;;  %659 = vmatpush1.bf16.msra.mxu1 %v989_v27  ;;  %v1035_v56 = vld [vmem:[#allocation2 + $0xb4] ss:$8 sps:$4 sm:$0xff]   ;;  %v975_v57 = vld [vmem:[%s1160_s0 + $0x8] ss:$24 sps:$4 sm:$0xff]   ;;  %v1037_v60 = vld [vmem:[#allocation2 + $0xb0] ss:$8 sps:$4 sm:$0xff]  }
  0x26   :  { %660 = vmatprep.subr.bf16.mxu1 %v993_v28  ;;  %v978_v58 = vld [vmem:[#allocation2 + $0x200] ss:$8 sps:$4 sm:$0xff]   ;;  %v986_v59 = vld [vmem:[#allocation2 + $0x214] ss:$8 sps:$4 sm:$0xff]   ;;  %v1041_v61 = vld [vmem:[#allocation2 + $0xc4] ss:$8 sps:$4 sm:$0xff]  }
  0x27   :  { %v1067_v62 = vld [vmem:[%s1160_s0 + $0x4] ss:$24 sps:$4 sm:$0xff]   ;;  %v984_v63 = vld [vmem:[#allocation2 + $0x210] ss:$8 sps:$4 sm:$0xff]   ;;  %v1043_v0 = vld [vmem:[#allocation2 + $0xc0] ss:$8 sps:$4 sm:$0xff]  }
  0x28   :  { %706 = vmatpush1.bf16.msra.mxu0 %v938_v11  ;;  %v1073_v1 = vld [vmem:[%s1160_s0 + $0x14] ss:$24 sps:$4 sm:$0xff]   ;;  %684 = vmatprep.mubr.bf16.mxu1 %v1067_v62  ;;  %v990_v4 = vld [vmem:[#allocation2 + $0x220] ss:$8 sps:$4 sm:$0xff]   ;;  %v1049_v5 = vld [vmem:[#allocation2 + $0xd0] ss:$8 sps:$4 sm:$0xff]  }
  0x29   :  { %707 = vmatprep.subr.bf16.mxu0 %v939_v12  ;;  %661 = vmatpush1.bf16.msra.mxu1 %v995_v31  ;;  %v992_v2 = vld [vmem:[#allocation2 + $0x224] ss:$8 sps:$4 sm:$0xff]   ;;  %v1047_v3 = vld [vmem:[#allocation2 + $0xd4] ss:$8 sps:$4 sm:$0xff]   ;;  %v996_v8 = vld [vmem:[#allocation2 + $0x230] ss:$8 sps:$4 sm:$0xff]  }
  0x2a   :  { %662 = vmatprep.subr.bf16.mxu1 %v999_v32  ;;  %v998_v6 = vld [vmem:[#allocation2 + $0x234] ss:$8 sps:$4 sm:$0xff]   ;;  %v1053_v7 = vld [vmem:[#allocation2 + $0xe4] ss:$8 sps:$4 sm:$0xff]   ;;  %v1055_v9 = vld [vmem:[#allocation2 + $0xe0] ss:$8 sps:$4 sm:$0xff]  }
  0x2b   :  { %v1004_v10 = vld [vmem:[#allocation2 + $0x244] ss:$8 sps:$4 sm:$0xff]   ;;  %v1059_v11 = vld [vmem:[#allocation2 + $0xf4] ss:$8 sps:$4 sm:$0xff]   ;;  %v1002_v12 = vld [vmem:[#allocation2 + $0x240] ss:$8 sps:$4 sm:$0xff]  }
  0x2c   :  { %708 = vmatpush1.bf16.msra.mxu0 %v941_v15  ;;  %v1061_v13 = vld [vmem:[#allocation2 + $0xf0] ss:$8 sps:$4 sm:$0xff]   ;;  %v1010_v14 = vld [vmem:[#allocation2 + $0x254] ss:$8 sps:$4 sm:$0xff]   ;;  %v1016_v17 = vld [vmem:[#allocation2 + $0x264] ss:$8 sps:$4 sm:$0xff]  }
  0x2d   :  { %709 = vmatprep.subr.bf16.mxu0 %v942_v18  ;;  %663 = vmatpush1.bf16.msra.mxu1 %v1001_v35  ;;  %v1065_v15 = vld [vmem:[%s1160_s0] ss:$24 sps:$4 sm:$0xff]   ;;  %v1022_v19 = vld [vmem:[#allocation2 + $0x274] ss:$8 sps:$4 sm:$0xff]   ;;  %v1028_v21 = vld [vmem:[#allocation2 + $0x284] ss:$8 sps:$4 sm:$0xff]  }
  0x2e   :  { %664 = vmatprep.subr.bf16.mxu1 %v1005_v36  ;;  %v1008_v16 = vld [vmem:[#allocation2 + $0x250] ss:$8 sps:$4 sm:$0xff]   ;;  %v1014_v18 = vld [vmem:[#allocation2 + $0x260] ss:$8 sps:$4 sm:$0xff]   ;;  %v1040_v25 = vld [vmem:[#allocation2 + $0x2a4] ss:$8 sps:$4 sm:$0xff]  }
  0x2f   :  { %v1026_v22 = vld [vmem:[#allocation2 + $0x280] ss:$8 sps:$4 sm:$0xff]   ;;  %v1046_v27 = vld [vmem:[#allocation2 + $0x2b4] ss:$8 sps:$4 sm:$0xff]   ;;  %v1044_v28 = vld [vmem:[#allocation2 + $0x2b0] ss:$8 sps:$4 sm:$0xff]  }
  0x30   :  { %710 = vmatpush1.bf16.msra.mxu0 %v944_v20  ;;  %v1020_v20 = vld [vmem:[#allocation2 + $0x270] ss:$8 sps:$4 sm:$0xff]   ;;  %v1058_v31 = vld [vmem:[#allocation2 + $0x2d4] ss:$8 sps:$4 sm:$0xff]  }
  0x31   :  { %711 = vmatprep.subr.bf16.mxu0 %v945_v23  ;;  %665 = vmatpush1.bf16.msra.mxu1 %v1007_v39  ;;  %v1034_v23 = vld [vmem:[#allocation2 + $0x294] ss:$8 sps:$4 sm:$0xff]   ;;  %v1056_v32 = vld [vmem:[#allocation2 + $0x2d0] ss:$8 sps:$4 sm:$0xff]  }
  0x32   :  { %666 = vmatprep.subr.bf16.mxu1 %v1011_v40  ;;  %v1070_v35 = vld [vmem:[#allocation2 + $0x2f4] ss:$8 sps:$4 sm:$0xff]   ;;  %v1068_v36 = vld [vmem:[#allocation2 + $0x2f0] ss:$8 sps:$4 sm:$0xff]  }
  0x34   :  { %712 = vmatpush1.bf16.msra.mxu0 %v947_v24  ;;  %v1032_v24 = vld [vmem:[#allocation2 + $0x290] ss:$8 sps:$4 sm:$0xff]  }
  0x35   :  { %713 = vmatprep.subr.bf16.mxu0 %v948_v26  ;;  %667 = vmatpush1.bf16.msra.mxu1 %v1013_v43  ;;  %v1038_v26 = vld [vmem:[#allocation2 + $0x2a0] ss:$8 sps:$4 sm:$0xff]  }
  0x36   :  { %668 = vmatprep.subr.bf16.mxu1 %v1017_v44 }
  0x38   :  { %714 = vmatpush1.bf16.msra.mxu0 %v950_v29  ;;  %v1052_v29 = vld [vmem:[#allocation2 + $0x2c4] ss:$8 sps:$4 sm:$0xff]  }
  0x39   :  { %715 = vmatprep.subr.bf16.mxu0 %v951_v30  ;;  %669 = vmatpush1.bf16.msra.mxu1 %v1019_v47  ;;  %v1050_v30 = vld [vmem:[#allocation2 + $0x2c0] ss:$8 sps:$4 sm:$0xff]  }
  0x3a   :  { %670 = vmatprep.subr.bf16.mxu1 %v1023_v48 }
  0x3c   :  { %716 = vmatpush1.bf16.msra.mxu0 %v953_v33  ;;  %v1064_v33 = vld [vmem:[#allocation2 + $0x2e4] ss:$8 sps:$4 sm:$0xff]  }
  0x3d   :  { %717 = vmatprep.subr.bf16.mxu0 %v954_v34  ;;  %671 = vmatpush1.bf16.msra.mxu1 %v1025_v51  ;;  %v1062_v34 = vld [vmem:[#allocation2 + $0x2e0] ss:$8 sps:$4 sm:$0xff]  }
  0x3e   :  { %672 = vmatprep.subr.bf16.mxu1 %v1029_v52 }
  0x40   :  { %718 = vmatpush1.bf16.msra.mxu0 %v956_v37  ;;  %v1071_v37 = vld [vmem:[%s1160_s0 + $0x10] ss:$24 sps:$4 sm:$0xff]  }
  0x41   :  { %719 = vmatprep.subr.bf16.mxu0 %v957_v38  ;;  %673 = vmatpush1.bf16.msra.mxu1 %v1031_v55 }
  0x42   :  { %674 = vmatprep.subr.bf16.mxu1 %v1035_v56 }
  0x44   :  { %720 = vmatpush1.bf16.msra.mxu0 %v959_v41 }
  0x45   :  { %721 = vmatprep.subr.bf16.mxu0 %v960_v42  ;;  %675 = vmatpush1.bf16.msra.mxu1 %v1037_v60  ;;  %v132_v42 = vlaneseq }
  0x46   :  { %676 = vmatprep.subr.bf16.mxu1 %v1041_v61 }
  0x47   :  { %v133_v43 = vshrl.u32 %v132_v42, 7 }
  0x48   :  { %722 = vmatpush1.bf16.msra.mxu0 %v962_v45  ;;  %v130_v45 = vld [vmem:[%s1162_s2] sm:$0x3] }
  0x49   :  { %723 = vmatprep.subr.bf16.mxu0 %v963_v46  ;;  %677 = vmatpush1.bf16.msra.mxu1 %v1043_v0  ;;  %v134_v44 = vsub.s32 0, %v133_v43  ;;  %v138_v46 = vsub.s32 1, %v133_v43 }
  0x4a   :  { %678 = vmatprep.subr.bf16.mxu1 %v1047_v3 }
  0x4b   :  { %v135_v47 = vrot.slane %v130_v45, %v134_v44  ;;  %v139_v48 = vrot.slane %v130_v45, %v138_v46 }
  0x4c   :  { %724 = vmatpush1.bf16.msra.mxu0 %v965_v49 }
  0x4d   :  { %725 = vmatprep.subr.bf16.mxu0 %v969_v50  ;;  %679 = vmatpush1.bf16.msra.mxu1 %v1049_v5 }
  0x4e   :  { %680 = vmatprep.subr.bf16.mxu1 %v1053_v7 }
  0x50   :  { %726 = vmatpush1.bf16.msra.mxu0 %v971_v53 }
  0x51   :  { %738 = vmatprep.subr.bf16.mxu0 %v980_v54  ;;  %681 = vmatpush1.bf16.msra.mxu1 %v1055_v9 }
  0x52   :  { %682 = vmatprep.subr.bf16.mxu1 %v1059_v11 }
  0x53   :  { %728 = vmatmul.mubr.bf16.vlgmr.msra.gmra.mrb[0].mxu0 %v975_v57 }
  0x54   :  { %739 = vmatpush1.bf16.msra.mxu0 %v978_v58  ;;  %770 = vmatprep.mubr.bf16.mxu0 %v1073_v1 }
  0x55   :  { %740 = vmatprep.subr.bf16.mxu0 %v986_v59  ;;  %683 = vmatpush1.bf16.msra.mxu1 %v1061_v13 }
  0x58   :  { %741 = vmatpush1.bf16.msra.mxu0 %v984_v63  ;;  %685 = vmatmul.mubr.bf16.vlgmr.msra.gmra.mrb[0].mxu1 %v1065_v15 }
  0x59   :  { %742 = vmatprep.subr.bf16.mxu0 %v992_v2 }
  0x5c   :  { %743 = vmatpush1.bf16.msra.mxu0 %v990_v4 }
  0x5d   :  { %744 = vmatprep.subr.bf16.mxu0 %v998_v6 }
  0x60   :  { %745 = vmatpush1.bf16.msra.mxu0 %v996_v8 }
  0x61   :  { %746 = vmatprep.subr.bf16.mxu0 %v1004_v10 }
  0x64   :  { %747 = vmatpush1.bf16.msra.mxu0 %v1002_v12 }
  0x65   :  { %748 = vmatprep.subr.bf16.mxu0 %v1010_v14 }
  0x68   :  { %749 = vmatpush1.bf16.msra.mxu0 %v1008_v16 }
  0x69   :  { %750 = vmatprep.subr.bf16.mxu0 %v1016_v17 }
  0x6c   :  { %751 = vmatpush1.bf16.msra.mxu0 %v1014_v18 }
  0x6d   :  { %752 = vmatprep.subr.bf16.mxu0 %v1022_v19 }
  0x70   :  { %753 = vmatpush1.bf16.msra.mxu0 %v1020_v20 }
  0x71   :  { %754 = vmatprep.subr.bf16.mxu0 %v1028_v21 }
  0x74   :  { %755 = vmatpush1.bf16.msra.mxu0 %v1026_v22 }
  0x75   :  { %756 = vmatprep.subr.bf16.mxu0 %v1034_v23 }
  0x78   :  { %757 = vmatpush1.bf16.msra.mxu0 %v1032_v24 }
  0x79   :  { %758 = vmatprep.subr.bf16.mxu0 %v1040_v25 }
  0x7c   :  { %759 = vmatpush1.bf16.msra.mxu0 %v1038_v26 }
  0x7d   :  { %760 = vmatprep.subr.bf16.mxu0 %v1046_v27 }
  0x80   :  { %761 = vmatpush1.bf16.msra.mxu0 %v1044_v28 }
  0x81   :  { %762 = vmatprep.subr.bf16.mxu0 %v1052_v29 }
  0x84   :  { %763 = vmatpush1.bf16.msra.mxu0 %v1050_v30 }
  0x85   :  { %764 = vmatprep.subr.bf16.mxu0 %v1058_v31 }
  0x88   :  { %765 = vmatpush1.bf16.msra.mxu0 %v1056_v32 }
  0x89   :  { %766 = vmatprep.subr.bf16.mxu0 %v1064_v33 }
  0x8c   :  { %767 = vmatpush1.bf16.msra.mxu0 %v1062_v34 }
  0x8d   :  { %768 = vmatprep.subr.bf16.mxu0 %v1070_v35 }
  0x90   :  { %769 = vmatpush1.bf16.msra.mxu0 %v1068_v36 }
  0x93   :  { %771 = vmatmul.mubr.bf16.vlgmr.msra.gmra.mrb[0].mxu0 %v1071_v37 }
 0x12b   :  { %v686_v38 = vpop.f32.mrb[0].mxu1 }
 0x12c   :  { %v688_v39 = vpop.f32.mrb[1].mxu1  ;;  %v687_v49 = vadd.f32 %v686_v38, %v135_v47 }
 0x12d   :  { %v690_v40 = vpop.f32.mrb[2].mxu1  ;;  %v689_v50 = vadd.f32 %v688_v39, %v139_v48 }
 0x12e   :  { %v692_v41 = vpop.f32.mrb[3].mxu1  ;;  %v691_v52 = vadd.f32 %v690_v40, %v135_v47 }
 0x12f   :  { %v693_v55 = vadd.f32 %v692_v41, %v139_v48 }
 0x166   :  { %v772_v51 = vpop.f32.mrb[0].mxu0 }
 0x167   :  { %v907_v53 = vadd.f32 %v772_v51, %v687_v49  ;;  %v774_v54 = vpop.f32.mrb[1].mxu0 }
 0x168   :  { %v909_v56 = vadd.f32 %v774_v54, %v689_v50  ;;  %v776_v57 = vpop.f32.mrb[2].mxu0 }
 0x169   :  { %v911_v58 = vadd.f32 %v776_v57, %v691_v52  ;;  %v778_v59 = vpop.f32.mrb[3].mxu0 }
 0x16a   :  { %v904_v60 = vpack.c.bf16 %v909_v56, %v907_v53  ;;  %v913_v61 = vadd.f32 %v778_v59, %v693_v55 }
 0x16c   :  { %793 = vst [vmem:[%s1163_s3] sm:$0xff] %v904_v60  ;;  %v905_v62 = vpack.c.bf16 %v913_v61, %v911_v58 }
 0x16e   :  { %794 = vst [vmem:[%s1163_s3 + $0x8] sm:$0xff] %v905_v62 }
 0x16f   :  { %799 = vsyncpa [#allocation3], 1 }

// kernel: deg_lstm_forward.5
= control target key start
LH: loop header
LB: loop body
LE: loop exit
PB: predicated region body
PF: predicated region fallthrough
CT: control target
= control target key end

     0   :  { %vm20_vm0 = vcmask 517120   ;;  %v241_v3 = vmov 0.0   ;;  %s302_s25 = smov 0   ;;  %s336_s0 = inlined_call_operand.vmem [shape: bf16[8,2,256], index: 0, kind: input, shape index: {}]   ;;  %s337_s1 = inlined_call_operand.vmem [shape: bf16[64,256], index: 1, kind: input, shape index: {}]   ;;  %s338_s2 = inlined_call_operand.vmem [shape: bf16[8,2,64], index: 2, kind: output, shape index: {}]  }
   0x1   :  { %v263_v0 = vld [vmem:[%s337_s1] sm:$0xff]  ;;  %v268_v1 = vld [vmem:[%s337_s1 + $0x8] sm:$0xff]  ;;  %v273_v2 = vld [vmem:[%s337_s1 + $0x10] sm:$0xff]  ;;  %21 = vst.msk [vmem:[#allocation2] sm:$0x3] %vm20_vm0, %v241_v3 }
   0x2   :  { %22 = vst.msk [vmem:[#allocation3] sm:$0x3] %vm20_vm0, %v241_v3  ;;  %v280_v4 = vld [vmem:[%s337_s1 + $0x18] sm:$0xff]  ;;  %v285_v5 = vld [vmem:[%s337_s1 + $0x20] sm:$0xff]  ;;  %v290_v6 = vld [vmem:[%s337_s1 + $0x28] sm:$0xff] }
   0x3   :  { %v295_v7 = vld [vmem:[%s337_s1 + $0x30] sm:$0xff]  ;;  %v300_v8 = vld [vmem:[%s337_s1 + $0x38] sm:$0xff] }
   0x4 LB: > { %v203_v9 = vcombine.high %v263_v0, %v268_v1  ;;  %v202_v10 = vcombine.low %v263_v0, %v268_v1  ;;  %v205_v11 = vcombine.high %v273_v2, %v280_v4  ;;  %v204_v12 = vcombine.low %v273_v2, %v280_v4  ;;  %s201_s1 = sshll.u32 %s239_s25, 1  ;;  %s244_s29 = smov 64   ;;  %s239_s25 = sphi %s302_s25, %s28_s25  }
   0x5   : > { %v242_v13 = vmov 0   ;;  %v207_v14 = vcombine.high %v285_v5, %v290_v6  ;;  %v206_v15 = vcombine.low %v285_v5, %v290_v6  ;;  %v209_v16 = vcombine.high %v295_v7, %v300_v8  ;;  %s30_s28 = scalar_lea.vmem %s336_s0, %s201_s1  ;;  %s186_s4 = scalar_lea.vmem %s338_s2, %s239_s25 }
   0x6   : > { %79 = vmatprep.subr.bf16.mxu0 %v203_v9  ;;  %111 = vmatprep.mubr.bf16.mxu0 %v242_v13  ;;  %v208_v17 = vcombine.low %v295_v7, %v300_v8  ;;  %vm75_vm1 = vcmask 523264   ;;  %v243_v20 = vmov 1983009808   ;;  %v126_v22 = vlaneseq  ;;  %v31_v25 = vld [vmem:[%s30_s28] sm:$0x3]  ;;  %s28_s25 = sadd.s32 1, %s239_s25  }
   0x7   : > { %80 = vmatpush1.bf16.msra.mxu0 %v202_v10  ;;  %v124_v21 = vunpack.c.l.s4 %v243_v20  ;;  %v32_v31 = vunpack.c.l.bf16 %v31_v25  ;;  %vm187_vm2 = vcmask 516096   ;;  %p25_p0 = scmp.ge.s32.totalorder %s28_s25, 8  }
   0x8   : > { %81 = vmatprep.subr.bf16.mxu0 %v205_v11  ;;  %v33_v18 = vld [vmem:[#allocation2] sm:$0x3]  ;;  %v127_v24 = vshrl.u32 %v126_v22, 7 }
   0x9   : > { %v34_v19 = vpack.c.bf16 %v33_v18, %v33_v18  ;;  %v125_v23 = vunpack.c.0.s8 %v124_v21  ;;  %v212_v35 = vld.sshfl [vmem:[#allocation3] sm:$0x3 pattern:$0x76325410] }
   0xb   : > { %82 = vmatpush1.bf16.msra.mxu0 %v204_v12  ;;  %v128_v27 = vsub.s32 %v125_v23, %v127_v24 }
   0xc   : > { %83 = vmatprep.subr.bf16.mxu0 %v207_v14 }
   0xf   : > { %84 = vmatpush1.bf16.msra.mxu0 %v206_v15 }
  0x10   : > { %85 = vmatprep.subr.bf16.mxu0 %v209_v16 }
  0x13   : > { %86 = vmatpush1.bf16.msra.mxu0 %v208_v17 }
  0x16   : > { %210 = vmatmul.mubr.msk.bf16.vlgmr.msra.gmra.mrb[0].mxu0 %vm75_vm1, %v34_v19 }
  0xe9   : > { %v113_v26 = vpop.f32.mrb[0].mxu0 }
  0xea   : > { %v115_v28 = vpop.f32.mrb[1].mxu0 }
  0xeb   : > { %v122_v29 = vcombine.low %v113_v26, %v115_v28  ;;  %v117_v30 = vpop.f32.mrb[2].mxu0 }
  0xec   : > { %v118_v32 = vpop.f32.mrb[3].mxu0 }
  0xed   : > { %v129_v33 = vrot.slane %v122_v29, %v128_v27 }
  0xef   : > { %v131_v34 = vadd.f32 %v129_v33, %v32_v31 }
  0xf1   : > { %139 = vrot.lane.b32.xlu0 %v131_v34, %s244_s29  ;;  %v211_v36 = vmul.f32 -1.442695, %v131_v34 }
  0xf3   : > { %225 = vpow2.f32 %v211_v36 }
  0xf5   : > { %153 = vrot.lane.b32.xlu0 %v212_v35, %s244_s29 }
  0xfd   : > { %v226_v37 = vpop.eup %225 }
  0xfe   : > { %v135_v38 = vadd.f32 1.0, %v226_v37 }
 0x100   : > { %227 = vrcp.f32 %v135_v38 }
 0x10a   : > { %v228_v41 = vpop.eup %227 }
 0x10b   : > { %v165_v51 = vrot.slane %v228_v41, 2 }
 0x163   : > { %v140_v39 = vpop.permute.xlu0 %139 }
 0x164   : > { %v141_v40 = vrot.slane %v140_v39, 2 }
 0x166   : > { %229 = vtanh.f32 %v141_v40 }
 0x167   : > { %v154_v44 = vpop.permute.xlu0 %153 }
 0x168   : > { %v156_v45 = vmul.f32 %v228_v41, %v154_v44 }
 0x170   : > { %v230_v42 = vpop.eup %229 }
 0x171   : > { %v157_v43 = vmul.f32 %v230_v42, %v228_v41 }
 0x173   : > { %159 = vrot.lane.b32.xlu1 %v157_v43, %s244_s29 }
 0x1e5   : > { %v160_v46 = vpop.permute.xlu1 %159 }
 0x1e6   : > { %v162_v47 = vadd.f32 %v160_v46, %v156_v45 }
 0x1e8   : > { %231 = vtanh.f32 %v162_v47  ;;  %v179_v48 = vrot.slane %v162_v47, %v128_v27 }
 0x1ea   : > { %180 = vrot.lane.b32.xlu0 %v179_v48, %s244_s29 }
 0x1f2   : > { %v232_v49 = vpop.eup %231 }
 0x1f3   : > { %168 = vrot.lane.b32.xlu1 %v232_v49, %s244_s29 }
 0x25c   : > { %v181_v50 = vpop.permute.xlu0 %180 }
 0x25d   : > { %183 = vst.msk [vmem:[#allocation3] sm:$0x3] %vm20_vm0, %v181_v50 }
 0x264   :  { %27 = sbr.rel (!%p25_p0) target bundleno = 4 (0x4), region = 37 }
 0x265   : > { %v169_v52 = vpop.permute.xlu1 %168 }
 0x266   : > { %v171_v53 = vmul.f32 %v169_v52, %v165_v51 }
 0x268   : > { %184 = vst.msk [vmem:[#allocation2] sm:$0x3] %vm20_vm0, %v171_v53  ;;  %v185_v54 = vpack.c.bf16 %v171_v53, %v171_v53 }
 0x26a   : > { %188 = vst.msk [vmem:[%s186_s4] sm:$0x1] %vm187_vm2, %v185_v54 }

// kernel: deg_lstm_forward.6
= control target key start
LH: loop header
LB: loop body
LE: loop exit
PB: predicated region body
PF: predicated region fallthrough
CT: control target
= control target key end

     0   :  { %v175_v1 = vmov 0   ;;  %vm82_vm0 = vcmask 523264   ;;  %v27_v10 = vlaneseq  ;;  %s232_s1 = inlined_call_operand.vmem [shape: bf16[64,256], index: 1, kind: input, shape index: {}]   ;;  %s233_s0 = inlined_call_operand.vmem [shape: bf16[16,64], index: 0, kind: input, shape index: {}]   ;;  %s234_s2 = inlined_call_operand.vmem [shape: f32[1,256], index: 2, kind: input, shape index: {}]   ;;  %s235_s3 = inlined_call_operand.vmem [shape: bf16[16,256], index: 3, kind: output, shape index: {}]  }
   0x1   :  { %v162_v0 = vld [vmem:[%s232_s1 + $0x4] ss:$8 sps:$4 sm:$0xff]   ;;  %118 = vmatprep.mubr.bf16.mxu0 %v175_v1  ;;  %v164_v2 = vld [vmem:[%s232_s1] ss:$8 sps:$4 sm:$0xff]   ;;  %v165_v3 = vld [vmem:[%s232_s1 + $0x14] ss:$8 sps:$4 sm:$0xff]  }
   0x2   :  { %86 = vmatprep.subr.bf16.mxu0 %v162_v0  ;;  %v167_v4 = vld [vmem:[%s232_s1 + $0x10] ss:$8 sps:$4 sm:$0xff]   ;;  %v168_v5 = vld [vmem:[%s232_s1 + $0x24] ss:$8 sps:$4 sm:$0xff]   ;;  %v170_v6 = vld [vmem:[%s232_s1 + $0x20] ss:$8 sps:$4 sm:$0xff]  }
   0x3   :  { %87 = vmatpush1.bf16.msra.mxu0 %v164_v2  ;;  %v171_v7 = vld [vmem:[%s232_s1 + $0x34] ss:$8 sps:$4 sm:$0xff]   ;;  %v173_v8 = vld [vmem:[%s232_s1 + $0x30] ss:$8 sps:$4 sm:$0xff]   ;;  %v174_v9 = vld [vmem:[%s233_s0] sm:$0xff]   ;;  %v28_v11 = vshrl.u32 %v27_v10, 7 }
   0x4   :  { %88 = vmatprep.subr.bf16.mxu0 %v165_v3  ;;  %v25_v13 = vld [vmem:[%s234_s2] sm:$0x3] }
   0x5   :  { %v29_v12 = vsub.s32 0, %v28_v11  ;;  %v33_v14 = vsub.s32 1, %v28_v11 }
   0x7   :  { %89 = vmatpush1.bf16.msra.mxu0 %v167_v4  ;;  %v30_v15 = vrot.slane %v25_v13, %v29_v12  ;;  %v34_v16 = vrot.slane %v25_v13, %v33_v14 }
   0x8   :  { %90 = vmatprep.subr.bf16.mxu0 %v168_v5 }
   0xb   :  { %91 = vmatpush1.bf16.msra.mxu0 %v170_v6 }
   0xc   :  { %92 = vmatprep.subr.bf16.mxu0 %v171_v7 }
   0xf   :  { %93 = vmatpush1.bf16.msra.mxu0 %v173_v8 }
  0x12   :  { %156 = vmatmul.mubr.msk.bf16.vlgmr.msra.gmra.mrb[0].mxu0 %vm82_vm0, %v174_v9 }
  0xe5   :  { %v120_v17 = vpop.f32.mrb[0].mxu0 }
  0xe6   :  { %v121_v18 = vadd.f32 %v120_v17, %v30_v15  ;;  %v122_v19 = vpop.f32.mrb[1].mxu0 }
  0xe7   :  { %v123_v20 = vadd.f32 %v122_v19, %v34_v16  ;;  %v124_v21 = vpop.f32.mrb[2].mxu0 }
  0xe8   :  { %v125_v22 = vadd.f32 %v124_v21, %v30_v15  ;;  %v126_v23 = vpop.f32.mrb[3].mxu0 }
  0xe9   :  { %v159_v24 = vpack.c.bf16 %v123_v20, %v121_v18  ;;  %v127_v25 = vadd.f32 %v126_v23, %v34_v16 }
  0xeb   :  { %141 = vst [vmem:[%s235_s3] sm:$0xff] %v159_v24  ;;  %v160_v26 = vpack.c.bf16 %v127_v25, %v125_v22 }
  0xed   :  { %142 = vst [vmem:[%s235_s3 + $0x8] sm:$0xff] %v160_v26 }

// kernel: deg_lstm_forward.7
= control target key start
LH: loop header
LB: loop body
LE: loop exit
PB: predicated region body
PF: predicated region fallthrough
CT: control target
= control target key end

     0   :  { %vm28_vm0 = vcmask 517120   ;;  %v414_v3 = vmov 0.0   ;;  %s494_s7 = smov 0   ;;  %s569_s0 = inlined_call_operand.vmem [shape: bf16[8,2,256], index: 0, kind: input, shape index: {}]   ;;  %s570_s1 = inlined_call_operand.vmem [shape: bf16[64,256], index: 1, kind: input, shape index: {}]   ;;  %s571_s2 = inlined_call_operand.vmem [shape: f32[1,64], index: 2, kind: input, shape index: {}]   ;;  %s572_s3 = inlined_call_operand.<no memory space> [shape: f32[1,1], index: 3, kind: input, shape index: {}]   ;;  %s573_s4 = inlined_call_operand.vmem [shape: f32[8,2,1], index: 4, kind: output, shape index: {}]  }
   0x1   :  { %9 = sst [smem:[#allocation6]] %s572_s3  ;;  %v450_v0 = vld [vmem:[%s571_s2] ss:$0 sm:$0xff]  ;;  %v460_v2 = vld [vmem:[%s570_s1 + $0x8] sm:$0xff]  ;;  %29 = vst.msk [vmem:[#allocation4] sm:$0x3] %vm28_vm0, %v414_v3 }
   0x2   :  { %v455_v1 = vld [vmem:[%s570_s1] sm:$0xff]  ;;  %30 = vst.msk [vmem:[#allocation5] sm:$0x3] %vm28_vm0, %v414_v3  ;;  %v467_v4 = vld [vmem:[%s570_s1 + $0x10] sm:$0xff]  ;;  %v472_v5 = vld [vmem:[%s570_s1 + $0x18] sm:$0xff] }
   0x3   :  { %v477_v6 = vld [vmem:[%s570_s1 + $0x20] sm:$0xff]  ;;  %v482_v7 = vld [vmem:[%s570_s1 + $0x28] sm:$0xff]  ;;  %v487_v8 = vld [vmem:[%s570_s1 + $0x30] sm:$0xff] }
   0x4   :  { %v492_v9 = vld [vmem:[%s570_s1 + $0x38] sm:$0xff] }
   0x5 LB: > { %v333_v10 = vcombine.high %v455_v1, %v460_v2  ;;  %v332_v11 = vcombine.low %v455_v1, %v460_v2  ;;  %v335_v12 = vcombine.high %v467_v4, %v472_v5  ;;  %v334_v13 = vcombine.low %v467_v4, %v472_v5  ;;  %s331_s1 = sshll.u32 %s412_s7, 1  ;;  %s417_s11 = smov 64   ;;  %s412_s7 = sphi %s494_s7, %s36_s7  }
   0x6   : > { %v415_v14 = vmov 0   ;;  %v337_v15 = vcombine.high %v477_v6, %v482_v7  ;;  %v336_v16 = vcombine.low %v477_v6, %v482_v7  ;;  %v339_v17 = vcombine.high %v487_v8, %v492_v9  ;;  %s38_s10 = scalar_lea.vmem %s569_s0, %s331_s1  ;;  %s418_s12 = smov 96  }
   0x7   : > { %87 = vmatprep.subr.bf16.mxu0 %v333_v10  ;;  %119 = vmatprep.mubr.bf16.mxu0 %v415_v14  ;;  %v338_v18 = vcombine.low %v487_v8, %v492_v9  ;;  %vm83_vm1 = vcmask 523264   ;;  %v416_v21 = vmov 1983009808   ;;  %v134_v23 = vlaneseq  ;;  %v39_v26 = vld [vmem:[%s38_s10] sm:$0x3]  ;;  %s204_s13 = scalar_lea.vmem [#allocation2], %s331_s1 }
   0x8   : > { %88 = vmatpush1.bf16.msra.mxu0 %v332_v11  ;;  %v41_v19 = vld [vmem:[#allocation4] sm:$0x3]  ;;  %v132_v22 = vunpack.c.l.s4 %v416_v21  ;;  %v40_v32 = vunpack.c.l.bf16 %v39_v26  ;;  %vm200_vm2 = vcmask 254976   ;;  %vm205_vm3 = vcmask 1024   ;;  %s221_s14 = ssub.s32 7, %s412_s7  ;;  %s36_s7 = sadd.s32 1, %s412_s7  }
   0x9   : > { %89 = vmatprep.subr.bf16.mxu0 %v335_v12  ;;  %v42_v20 = vpack.c.bf16 %v41_v19, %v41_v19  ;;  %v135_v25 = vshrl.u32 %v134_v23, 7  ;;  %v342_v36 = vld.sshfl [vmem:[#allocation5] sm:$0x3 pattern:$0x76325410]  ;;  %s344_s15 = sshll.u32 %s221_s14, 1 }
   0xa   : > { %v133_v24 = vunpack.c.0.s8 %v132_v22  ;;  %s223_s16 = scalar_lea.vmem [#allocation3], %s344_s15  ;;  %p33_p0 = scmp.ge.s32.totalorder %s36_s7, 8  }
   0xb   :  { %s249_s17 = sld [smem:[#allocation6]] (%p33_p0) }
   0xc   : > { %90 = vmatpush1.bf16.msra.mxu0 %v334_v13  ;;  %v136_v28 = vsub.s32 %v133_v24, %v135_v25 }
   0xd   : > { %91 = vmatprep.subr.bf16.mxu0 %v337_v15 }
  0x10   : > { %92 = vmatpush1.bf16.msra.mxu0 %v336_v16 }
  0x11   : > { %93 = vmatprep.subr.bf16.mxu0 %v339_v17  ;;  %v250_v5 = vstv (%p33_p0), %s249_s17 }
  0x14   : > { %94 = vmatpush1.bf16.msra.mxu0 %v338_v18 }
  0x17   : > { %340 = vmatmul.mubr.msk.bf16.vlgmr.msra.gmra.mrb[0].mxu0 %vm83_vm1, %v42_v20 }
  0xea   : > { %v121_v27 = vpop.f32.mrb[0].mxu0 }
  0xeb   : > { %v123_v29 = vpop.f32.mrb[1].mxu0 }
  0xec   : > { %v130_v30 = vcombine.low %v121_v27, %v123_v29  ;;  %v125_v31 = vpop.f32.mrb[2].mxu0 }
  0xed   : > { %v126_v33 = vpop.f32.mrb[3].mxu0 }
  0xee   : > { %v137_v34 = vrot.slane %v130_v30, %v136_v28 }
  0xf0   : > { %v139_v35 = vadd.f32 %v137_v34, %v40_v32 }
  0xf2   : > { %147 = vrot.lane.b32.xlu0 %v139_v35, %s417_s11  ;;  %v341_v37 = vmul.f32 -1.442695, %v139_v35 }
  0xf4   : > { %366 = vpow2.f32 %v341_v37 }
  0xf6   : > { %161 = vrot.lane.b32.xlu0 %v342_v36, %s417_s11 }
  0xfe   : > { %v367_v38 = vpop.eup %366 }
  0xff   : > { %v143_v39 = vadd.f32 1.0, %v367_v38 }
 0x101   : > { %368 = vrcp.f32 %v143_v39 }
 0x10b   : > { %v369_v42 = vpop.eup %368 }
 0x10c   : > { %v173_v50 = vrot.slane %v369_v42, 2 }
 0x164   : > { %v148_v40 = vpop.permute.xlu0 %147 }
 0x165   : > { %v149_v41 = vrot.slane %v148_v40, 2 }
 0x167   : > { %370 = vtanh.f32 %v149_v41 }
 0x168   : > { %v162_v45 = vpop.permute.xlu0 %161 }
 0x169   : > { %v164_v46 = vmul.f32 %v369_v42, %v162_v45 }
 0x171   : > { %v371_v43 = vpop.eup %370 }
 0x172   : > { %v165_v44 = vmul.f32 %v371_v43, %v369_v42 }
 0x174   : > { %167 = vrot.lane.b32.xlu1 %v165_v44, %s417_s11 }
 0x1e6   : > { %v168_v47 = vpop.permute.xlu1 %167 }
 0x1e7   : > { %v170_v48 = vadd.f32 %v168_v47, %v164_v46 }
 0x1e9   : > { %372 = vtanh.f32 %v170_v48  ;;  %v187_v58 = vrot.slane %v170_v48, %v136_v28 }
 0x1f3   : > { %v373_v49 = vpop.eup %372 }
 0x1f4   : > { %176 = vrot.lane.b32.xlu1 %v373_v49, %s417_s11 }
 0x266   : > { %v177_v51 = vpop.permute.xlu1 %176 }
 0x267   : > { %v179_v52 = vmul.f32 %v177_v51, %v173_v50 }
 0x269   : > { %192 = vst.msk [vmem:[#allocation4] sm:$0x3] %vm28_vm0, %v179_v52  ;;  %v199_v53 = vmul.f32 %v450_v0, %v179_v52 }
 0x26b   : > { %v201_v54 = vsel %vm200_vm2, %v199_v53, 0.0  ;;  %v214_v55 = vrot.slane %v199_v53, %v136_v28 }
 0x26c   : > { %202 = vadd.xlane.f32.xlu1 %v201_v54 }
 0x26d   : > { %215 = vrot.lane.b32.xlu0 %v214_v55, %s418_s12 }
 0x2df   : > { %v216_v56 = vpop.permute.xlu0 %215 }
 0x2e0   : > { %v218_v57 = vsel %vm200_vm2, %v216_v56, 0.0 }
 0x2e1   : > { %219 = vadd.xlane.f32.xlu0 %v218_v57 }
 0x2f7   : > { %188 = vrot.lane.b32.xlu0 %v187_v58, %s417_s11 }
 0x2f9   : > { %v203_v59 = vpop.xlane.xlu1 %202 }
 0x2fa   : > { %206 = vst.msk [vmem:[%s204_s13] sm:$0x3] %vm205_vm3, %v203_v59 }
 0x301   :  { %v225_v62 = vld [vmem:[#allocation2] sm:$0x3] (%p33_p0)  ;;  %v226_v3 = vld [vmem:[#allocation2 + $0x2] sm:$0x3] (%p33_p0)  ;;  %v227_v11 = vld [vmem:[#allocation2 + $0x4] sm:$0x3] (%p33_p0) }
 0x302   :  { %v228_v13 = vld [vmem:[#allocation2 + $0x6] sm:$0x3] (%p33_p0)  ;;  %v229_v19 = vld [vmem:[#allocation2 + $0x8] sm:$0x3] (%p33_p0)  ;;  %v230_v21 = vld [vmem:[#allocation2 + $0xa] sm:$0x3] (%p33_p0) }
 0x303   :  { %v231_v24 = vld [vmem:[#allocation2 + $0xc] sm:$0x3] (%p33_p0)  ;;  %v232_v2 = vld [vmem:[#allocation2 + $0xe] sm:$0x3] (%p33_p0) }
 0x36d   :  { %35 = sbr.rel (!%p33_p0) target bundleno = 5 (0x5), region = 46 }
 0x36e   : > { %v220_v60 = vpop.xlane.xlu0 %219 }
 0x36f   : > { %224 = vst.msk [vmem:[%s223_s16] sm:$0x3] %vm205_vm3, %v220_v60 }
 0x372   : > { %v189_v61 = vpop.permute.xlu0 %188 }
 0x373   : > { %191 = vst.msk [vmem:[#allocation5] sm:$0x3] %vm28_vm0, %v189_v61 }
 0x376   :  { %v233_v63 = vld [vmem:[#allocation3] sm:$0x3]  ;;  %v234_v10 = vld [vmem:[#allocation3 + $0x2] sm:$0x3]  ;;  %v235_v12 = vld [vmem:[#allocation3 + $0x4] sm:$0x3] }
 0x377   :  { %v236_v14 = vld [vmem:[#allocation3 + $0x6] sm:$0x3]  ;;  %v241_v15 = vadd.f32 %v233_v63, %v225_v62  ;;  %v242_v16 = vadd.f32 %v234_v10, %v226_v3  ;;  %v243_v17 = vadd.f32 %v235_v12, %v227_v11  ;;  %v237_v20 = vld [vmem:[#allocation3 + $0x8] sm:$0x3]  ;;  %v238_v23 = vld [vmem:[#allocation3 + $0xa] sm:$0x3] }
 0x378   :  { %v244_v18 = vadd.f32 %v236_v14, %v228_v13  ;;  %v245_v22 = vadd.f32 %v237_v20, %v229_v19  ;;  %v239_v25 = vld [vmem:[#allocation3 + $0xc] sm:$0x3]  ;;  %v246_v0 = vadd.f32 %v238_v23, %v230_v21  ;;  %v240_v4 = vld [vmem:[#allocation3 + $0xe] sm:$0x3] }
 0x379   :  { %v247_v1 = vadd.f32 %v239_v25, %v231_v24  ;;  %v248_v6 = vadd.f32 %v240_v4, %v232_v2  ;;  %v251_v7 = vadd.f32 %v250_v5, %v241_v15  ;;  %v252_v8 = vadd.f32 %v250_v5, %v242_v16 }
 0x37a   :  { %v253_v9 = vadd.f32 %v250_v5, %v243_v17  ;;  %v254_v26 = vadd.f32 %v250_v5, %v244_v18  ;;  %v255_v27 = vadd.f32 %v250_v5, %v245_v22  ;;  %v256_v28 = vadd.f32 %v250_v5, %v246_v0 }
 0x37b   :  { %v345_v29 = vmul.f32 -1.442695, %v251_v7  ;;  %v346_v30 = vmul.f32 -1.442695, %v252_v8  ;;  %v257_v32 = vadd.f32 %v250_v5, %v247_v1  ;;  %v258_v34 = vadd.f32 %v250_v5, %v248_v6 }
 0x37c   :  { %v347_v31 = vmul.f32 -1.442695, %v253_v9  ;;  %v348_v33 = vmul.f32 -1.442695, %v254_v26  ;;  %v349_v35 = vmul.f32 -1.442695, %v255_v27 }
 0x37d   :  { %374 = vpow2.f32 %v345_v29  ;;  %v350_v36 = vmul.f32 -1.442695, %v256_v28  ;;  %v351_v37 = vmul.f32 -1.442695, %v257_v32  ;;  %v352_v38 = vmul.f32 -1.442695, %v258_v34 }
 0x37e   :  { %376 = vpow2.f32 %v346_v30 }
 0x37f   :  { %378 = vpow2.f32 %v347_v31 }
 0x380   :  { %380 = vpow2.f32 %v348_v33 }
 0x381   :  { %382 = vpow2.f32 %v349_v35 }
 0x382   :  { %384 = vpow2.f32 %v350_v36 }
 0x383   :  { %386 = vpow2.f32 %v351_v37 }
 0x384   :  { %388 = vpow2.f32 %v352_v38 }
 0x387   :  { %v375_v39 = vpop.eup %374 }
 0x388   :  { %v377_v40 = vpop.eup %376  ;;  %v283_v41 = vadd.f32 1.0, %v375_v39 }
 0x389   :  { %v379_v42 = vpop.eup %378  ;;  %v284_v43 = vadd.f32 1.0, %v377_v40 }
 0x38a   :  { %v381_v44 = vpop.eup %380  ;;  %390 = vrcp.f32 %v283_v41  ;;  %v285_v45 = vadd.f32 1.0, %v379_v42 }
 0x38b   :  { %v383_v46 = vpop.eup %382  ;;  %392 = vrcp.f32 %v284_v43  ;;  %v286_v47 = vadd.f32 1.0, %v381_v44 }
 0x38c   :  { %v385_v48 = vpop.eup %384  ;;  %394 = vrcp.f32 %v285_v45  ;;  %v287_v49 = vadd.f32 1.0, %v383_v46 }
 0x38d   :  { %v387_v50 = vpop.eup %386  ;;  %396 = vrcp.f32 %v286_v47  ;;  %v288_v51 = vadd.f32 1.0, %v385_v48 }
 0x38e   :  { %v389_v52 = vpop.eup %388  ;;  %398 = vrcp.f32 %v287_v49  ;;  %v289_v53 = vadd.f32 1.0, %v387_v50 }
 0x38f   :  { %400 = vrcp.f32 %v288_v51  ;;  %v290_v54 = vadd.f32 1.0, %v389_v52 }
 0x390   :  { %402 = vrcp.f32 %v289_v53 }
 0x391   :  { %404 = vrcp.f32 %v290_v54 }
 0x394   :  { %v391_v55 = vpop.eup %390 }
 0x395   :  { %v393_v56 = vpop.eup %392  ;;  %308 = vst.msk [vmem:[%s573_s4] sm:$0x3] %vm205_vm3, %v391_v55 }
 0x396   :  { %v395_v57 = vpop.eup %394  ;;  %309 = vst.msk [vmem:[%s573_s4 + $0x2] sm:$0x3] %vm205_vm3, %v393_v56 }
 0x397   :  { %v397_v58 = vpop.eup %396  ;;  %310 = vst.msk [vmem:[%s573_s4 + $0x4] sm:$0x3] %vm205_vm3, %v395_v57 }
 0x398   :  { %v399_v59 = vpop.eup %398  ;;  %311 = vst.msk [vmem:[%s573_s4 + $0x6] sm:$0x3] %vm205_vm3, %v397_v58 }
 0x399   :  { %v401_v60 = vpop.eup %400  ;;  %312 = vst.msk [vmem:[%s573_s4 + $0x8] sm:$0x3] %vm205_vm3, %v399_v59 }
 0x39a   :  { %v403_v61 = vpop.eup %402  ;;  %313 = vst.msk [vmem:[%s573_s4 + $0xa] sm:$0x3] %vm205_vm3, %v401_v60 }
 0x39b   :  { %v405_v62 = vpop.eup %404  ;;  %314 = vst.msk [vmem:[%s573_s4 + $0xc] sm:$0x3] %vm205_vm3, %v403_v61 }
 0x39c   :  { %315 = vst.msk [vmem:[%s573_s4 + $0xe] sm:$0x3] %vm205_vm3, %v405_v62 }

</bundles_post_ra>
